<compile_context>
chip_gen: v7x
topology: tpu7x:2x2x1
jax: 0.10.0
libtpu: 0.0.40
codegen_flags: <defaults>
</compile_context>

<pallas_src>
import functools

import jax
import jax.numpy as jnp
from jax.experimental import pallas as pl
from jax.experimental.pallas import tpu as pltpu


def _map_fused_kernel(x_ref, w1_ref, w2_ref, scale_ref, shift1_ref, shift2_ref,
                      o_ref, act1_ref, act2_ref, *, H, W, Cin, Cout):
    """One batch element per grid step; all three conv+BN+ReLU stages fused.

    x_ref:      (1, H*W, 9*Cin)  bf16   stage-1 im2col patches (built in wrapper)
    w1_ref:     (9*Cin, Cout)    bf16   conv1 weights, rows ordered (dy, dx, cin)
    w2_ref:     (3, 3*Cout, Cout) bf16  conv2 weights, per-dy rows ordered (dx, cin)
    scale_ref:  (1, Cout) f32           folded BN scale  gamma / sqrt(var+eps)
    shift1/2:   (1, Cout) f32           folded BN shift + conv bias (conv1 / conv2)
    o_ref:      (1, H*W, Cout) f32      output slab
    act1/2_ref: (H+2, W, 3*Cout) bf16   im2col activation scratch:
                act[r, x, dx*C:(dx+1)*C] == padded_activation[r, x+dx, :]
    """
    C = Cout
    scale = scale_ref[...]     # (1, C)  broadcasts over the (H*W, C) accumulator
    shift1 = shift1_ref[...]
    shift2 = shift2_ref[...]

    # Halo rows = conv zero padding in y.  The interior rows (1..H) and the
    # x-padding columns are fully rewritten every step by write_act below, so
    # only these two rows need zeroing.  Done every step (cheap: a few vregs)
    # so correctness does not depend on which core runs which grid step.
    zrow = jnp.zeros((W, 3 * C), act1_ref.dtype)
    act1_ref[0, :, :] = zrow
    act1_ref[H + 1, :, :] = zrow
    act2_ref[0, :, :] = zrow
    act2_ref[H + 1, :, :] = zrow

    def write_act(act_ref, y_flat):
        """Write a stage output (H*W, C) f32 into the im2col scratch.

        Three full-width, sublane-aligned stores at lane offsets 0/C/2C; the
        conv x-padding is encoded as explicit zero columns in the shifted
        sources, so no stale VMEM is ever read.
        """
        y3 = y_flat.reshape(H, W, C)
        zc = jnp.zeros((H, 1, C), jnp.float32)
        left = jnp.concatenate([zc, y3[:, :W - 1, :]], axis=1)   # dx = 0 tap
        right = jnp.concatenate([y3[:, 1:, :], zc], axis=1)      # dx = 2 tap
        dt = act_ref.dtype
        act_ref[1:H + 1, :, 0 * C:1 * C] = left.astype(dt)
        act_ref[1:H + 1, :, 1 * C:2 * C] = y3.astype(dt)         # dx = 1 tap
        act_ref[1:H + 1, :, 2 * C:3 * C] = right.astype(dt)

    def conv2_bn_relu(act_ref, shift):
        """3x3 conv (Cout->Cout) + BN + ReLU from the im2col scratch."""
        acc = jnp.zeros((H * W, C), jnp.float32)
        for dy in range(3):
            # One aligned (H*W, 3*C) bf16 slab per dy -> one fat MXU matmul.
            p = act_ref[dy:dy + H, :, :].reshape(H * W, 3 * C)
            acc = acc + jnp.dot(p, w2_ref[dy],
                                preferred_element_type=jnp.float32)
        return jnp.maximum(acc * scale + shift, 0.0)

    # ---- stage 1: conv1 (Cin -> Cout) + BN + ReLU: single im2col matmul. ----
    acc1 = jnp.dot(x_ref[0], w1_ref[...], preferred_element_type=jnp.float32)
    y1 = jnp.maximum(acc1 * scale + shift1, 0.0)
    write_act(act1_ref, y1)

    # ---- stage 2: conv2 + BN + ReLU (input resident in VMEM scratch). ----
    y2 = conv2_bn_relu(act1_ref, shift2)
    write_act(act2_ref, y2)

    # ---- stage 3: conv2 + BN + ReLU; store the final activation. ----
    y3 = conv2_bn_relu(act2_ref, shift2)
    o_ref[0, :, :] = y3.astype(o_ref.dtype)


@jax.jit
def map_forward(x_nhwc, params):
    """Full Map.forward.  x_nhwc: (N, H, W, Cin) float32."""
    w1, b1, w2, b2, gamma, beta, mean, var, eps = params
    N, H, W, Cin = x_nhwc.shape
    Cout = w1.shape[-1]

    # Fold conv bias + BatchNorm (running stats) into per-channel scale/shift.
    s = gamma / jnp.sqrt(var + eps)
    scale = s.reshape(1, Cout)
    shift1 = (beta + (b1 - mean) * s).reshape(1, Cout)
    shift2 = (beta + (b2 - mean) * s).reshape(1, Cout)

    # Stage-1 im2col done once in the wrapper with cheap XLA ops:
    # patches[n, y*W+x, (dy*3+dx)*Cin + ci] = x_pad[n, y+dy, x+dx, ci].
    xp = jnp.pad(x_nhwc, ((0, 0), (1, 1), (1, 1), (0, 0)))
    taps = [xp[:, dy:dy + H, dx:dx + W, :] for dy in range(3) for dx in range(3)]
    patches = jnp.concatenate(taps, axis=-1).reshape(N, H * W, 9 * Cin)
    patches = patches.astype(jnp.bfloat16)                    # bf16 MXU operands

    w1_flat = w1.reshape(9 * Cin, Cout).astype(jnp.bfloat16)   # rows (dy, dx, cin)
    w2_pack = w2.reshape(3, 3 * Cout, Cout).astype(jnp.bfloat16)  # per-dy (dx, cin)

    kernel = functools.partial(_map_fused_kernel, H=H, W=W, Cin=Cin, Cout=Cout)
    out = pl.pallas_call(
        kernel,
        out_shape=jax.ShapeDtypeStruct((N, H * W, Cout), jnp.float32),
        grid_spec=pltpu.PrefetchScalarGridSpec(
            num_scalar_prefetch=0,
            grid=(N,),
            in_specs=[
                pl.BlockSpec((1, H * W, 9 * Cin), lambda n: (n, 0, 0)),
                pl.BlockSpec((9 * Cin, Cout), lambda n: (0, 0)),
                pl.BlockSpec((3, 3 * Cout, Cout), lambda n: (0, 0, 0)),
                pl.BlockSpec((1, Cout), lambda n: (0, 0)),
                pl.BlockSpec((1, Cout), lambda n: (0, 0)),
                pl.BlockSpec((1, Cout), lambda n: (0, 0)),
            ],
            out_specs=pl.BlockSpec((1, H * W, Cout), lambda n: (n, 0, 0)),
            scratch_shapes=[
                pltpu.VMEM((H + 2, W, 3 * Cout), jnp.bfloat16),  # stage-1 im2col act
                pltpu.VMEM((H + 2, W, 3 * Cout), jnp.bfloat16),  # stage-2 im2col act
            ],
        ),
        # Batch axis parallel -> one element per TensorCore on v7x; serial
        # (and harmless) on single-core v5e/v6e.
        compiler_params=pltpu.CompilerParams(dimension_semantics=("parallel",)),
    )(patches, w1_flat, w2_pack, scale, shift1, shift2)
    return out.reshape(N, H, W, Cout)


def _conv_bn_relu_ref(x, w, b, s, beta, mean, cast_bf16):
    if cast_bf16:
        x = x.astype(jnp.bfloat16)
        w = w.astype(jnp.bfloat16)
    y = jax.lax.conv_general_dilated(
        x, w, window_strides=(1, 1), padding=((1, 1), (1, 1)),
        dimension_numbers=("NHWC", "HWIO", "NHWC"),
        preferred_element_type=jnp.float32)
    y = (y + b - mean) * s + beta
    return jnp.maximum(y, 0.0)


def _ref_forward(x_nhwc, params, cast_bf16=False):
    """Pure-JAX reference (lax conv).  cast_bf16=True reproduces the kernel's
    bf16 MXU-operand quantisation (f32 accumulation in both cases)."""
    w1, b1, w2, b2, gamma, beta, mean, var, eps = params
    s = gamma / jnp.sqrt(var + eps)
    y = _conv_bn_relu_ref(x_nhwc, w1, b1, s, beta, mean, cast_bf16)
    y = _conv_bn_relu_ref(y, w2, b2, s, beta, mean, cast_bf16)
    y = _conv_bn_relu_ref(y, w2, b2, s, beta, mean, cast_bf16)
    return y


if __name__ == "__main__":
    key = jax.random.PRNGKey(0)
    N, Cin, H, W = 2, 4, 16, 16
    Cout = 64
    eps = 1e-5

    keys = jax.random.split(key, 8)
    x_nchw = jax.random.normal(keys[0], (N, Cin, H, W), jnp.float32)  # PyTorch layout
    x_nhwc = jnp.transpose(x_nchw, (0, 2, 3, 1))                      # kernel layout

    # Deterministic parameter init (shapes from Map.__init__); HWIO conv weights.
    bound1 = 1.0 / jnp.sqrt(Cin * 9.0)
    bound2 = 1.0 / jnp.sqrt(Cout * 9.0)
    w1 = jax.random.uniform(keys[1], (3, 3, Cin, Cout), jnp.float32, -bound1, bound1)
    b1 = jax.random.uniform(keys[2], (Cout,), jnp.float32, -bound1, bound1)
    w2 = jax.random.uniform(keys[3], (3, 3, Cout, Cout), jnp.float32, -bound2, bound2)
    b2 = jax.random.uniform(keys[4], (Cout,), jnp.float32, -bound2, bound2)
    gamma = 1.0 + 0.1 * jax.random.normal(keys[5], (Cout,), jnp.float32)
    beta = 0.1 * jax.random.normal(keys[6], (Cout,), jnp.float32)
    running_mean = 0.1 * jax.random.normal(keys[7], (Cout,), jnp.float32)
    running_var = jnp.ones((Cout,), jnp.float32)

    params = (w1, b1, w2, b2, gamma, beta, running_mean, running_var, eps)

    out = map_forward(x_nhwc, params)
    jax.block_until_ready(out)
    assert out.shape == (N, H, W, Cout)

    # Tight check vs. a numerics-matched reference (same bf16 operand
    # quantisation, f32 accumulation) ...
    ref_bf16 = _ref_forward(x_nhwc, params, cast_bf16=True)
    assert jnp.allclose(out, ref_bf16, rtol=5e-3, atol=5e-3), \
        "mismatch vs bf16-matched JAX reference"

    # ... plus a loose sanity bound against the full-f32 reference (bounds the
    # bf16 MXU-operand quantisation error).
    ref_f32 = _ref_forward(x_nhwc, params, cast_bf16=False)
    assert jnp.allclose(out, ref_f32, rtol=5e-2, atol=5e-2), \
        "mismatch vs f32 JAX reference"

    print("KERNEL_OK")
</pallas_src>

<mosaic_0001>
module attributes {stable_mosaic.version = 11 : i64} {
  func.func @_map_fused_kernel(%arg0: i32, %arg1: memref<1x256x36xbf16, #tpu.memory_space<vmem>>, %arg2: memref<36x64xbf16, #tpu.memory_space<vmem>>, %arg3: memref<3x192x64xbf16, #tpu.memory_space<vmem>>, %arg4: memref<1x64xf32, #tpu.memory_space<vmem>>, %arg5: memref<1x64xf32, #tpu.memory_space<vmem>>, %arg6: memref<1x64xf32, #tpu.memory_space<vmem>>, %arg7: memref<1x256x64xf32, #tpu.memory_space<vmem>>, %arg8: memref<18x16x192xbf16, #tpu.memory_space<vmem>>, %arg9: memref<18x16x192xbf16, #tpu.memory_space<vmem>>) attributes {dimension_semantics = [#tpu.dimension_semantics<parallel>], iteration_bounds = array<i64: 2>, scalar_prefetch = 0 : i64, scratch_operands = 2 : i64, tpu.core_type = #tpu.core_type<tc>, window_params = [{transform_indices = @transform_0, window_bounds = array<i64: 1, 256, 36>}, {pipeline_mode = #tpu.pipeline_mode<synchronous>, transform_indices = @transform_1, window_bounds = array<i64: 36, 64>}, {pipeline_mode = #tpu.pipeline_mode<synchronous>, transform_indices = @transform_2, window_bounds = array<i64: 3, 192, 64>}, {pipeline_mode = #tpu.pipeline_mode<synchronous>, transform_indices = @transform_3, window_bounds = array<i64: 1, 64>}, {pipeline_mode = #tpu.pipeline_mode<synchronous>, transform_indices = @transform_4, window_bounds = array<i64: 1, 64>}, {pipeline_mode = #tpu.pipeline_mode<synchronous>, transform_indices = @transform_5, window_bounds = array<i64: 1, 64>}, {transform_indices = @transform_6, window_bounds = array<i64: 1, 256, 64>}]} {
    %c0 = arith.constant 0 : index
    %c0_0 = arith.constant 0 : index
    %0 = vector.load %arg4[%c0, %c0_0] : memref<1x64xf32, #tpu.memory_space<vmem>>, vector<1x64xf32>
    %c0_1 = arith.constant 0 : index
    %c0_2 = arith.constant 0 : index
    %1 = vector.load %arg5[%c0_1, %c0_2] : memref<1x64xf32, #tpu.memory_space<vmem>>, vector<1x64xf32>
    %c0_3 = arith.constant 0 : index
    %c0_4 = arith.constant 0 : index
    %2 = vector.load %arg6[%c0_3, %c0_4] : memref<1x64xf32, #tpu.memory_space<vmem>>, vector<1x64xf32>
    %cst = arith.constant 0.000000e+00 : bf16
    %3 = vector.broadcast %cst : bf16 to vector<16x192xbf16>
    %c0_5 = arith.constant 0 : index
    %c0_6 = arith.constant 0 : index
    %c0_7 = arith.constant 0 : index
    %4 = vector.load %arg8[%c0_5, %c0_6, %c0_7] : memref<18x16x192xbf16, #tpu.memory_space<vmem>>, vector<1x16x192xbf16>
    %5 = vector.shape_cast %4 : vector<1x16x192xbf16> to vector<16x192xbf16>
    %6 = vector.shape_cast %3 : vector<16x192xbf16> to vector<1x16x192xbf16>
    tpu.vector_store %arg8[%c0_5, %c0_6, %c0_7], %6 {strides = array<i32>} : memref<18x16x192xbf16, #tpu.memory_space<vmem>>, vector<1x16x192xbf16>,
    %c17 = arith.constant 17 : index
    %c0_8 = arith.constant 0 : index
    %c0_9 = arith.constant 0 : index
    %7 = vector.load %arg8[%c17, %c0_8, %c0_9] : memref<18x16x192xbf16, #tpu.memory_space<vmem>>, vector<1x16x192xbf16>
    %8 = vector.shape_cast %7 : vector<1x16x192xbf16> to vector<16x192xbf16>
    %9 = vector.shape_cast %3 : vector<16x192xbf16> to vector<1x16x192xbf16>
    tpu.vector_store %arg8[%c17, %c0_8, %c0_9], %9 {strides = array<i32>} : memref<18x16x192xbf16, #tpu.memory_space<vmem>>, vector<1x16x192xbf16>,
    %c0_10 = arith.constant 0 : index
    %c0_11 = arith.constant 0 : index
    %c0_12 = arith.constant 0 : index
    %10 = vector.load %arg9[%c0_10, %c0_11, %c0_12] : memref<18x16x192xbf16, #tpu.memory_space<vmem>>, vector<1x16x192xbf16>
    %11 = vector.shape_cast %10 : vector<1x16x192xbf16> to vector<16x192xbf16>
    %12 = vector.shape_cast %3 : vector<16x192xbf16> to vector<1x16x192xbf16>
    tpu.vector_store %arg9[%c0_10, %c0_11, %c0_12], %12 {strides = array<i32>} : memref<18x16x192xbf16, #tpu.memory_space<vmem>>, vector<1x16x192xbf16>,
    %c17_13 = arith.constant 17 : index
    %c0_14 = arith.constant 0 : index
    %c0_15 = arith.constant 0 : index
    %13 = vector.load %arg9[%c17_13, %c0_14, %c0_15] : memref<18x16x192xbf16, #tpu.memory_space<vmem>>, vector<1x16x192xbf16>
    %14 = vector.shape_cast %13 : vector<1x16x192xbf16> to vector<16x192xbf16>
    %15 = vector.shape_cast %3 : vector<16x192xbf16> to vector<1x16x192xbf16>
    tpu.vector_store %arg9[%c17_13, %c0_14, %c0_15], %15 {strides = array<i32>} : memref<18x16x192xbf16, #tpu.memory_space<vmem>>, vector<1x16x192xbf16>,
    %c0_16 = arith.constant 0 : index
    %c0_17 = arith.constant 0 : index
    %c0_18 = arith.constant 0 : index
    %16 = vector.load %arg1[%c0_16, %c0_17, %c0_18] : memref<1x256x36xbf16, #tpu.memory_space<vmem>>, vector<1x256x36xbf16>
    %17 = vector.shape_cast %16 : vector<1x256x36xbf16> to vector<256x36xbf16>
    %c0_19 = arith.constant 0 : index
    %c0_20 = arith.constant 0 : index
    %18 = vector.load %arg2[%c0_19, %c0_20] : memref<36x64xbf16, #tpu.memory_space<vmem>>, vector<36x64xbf16>
    %cst_21 = arith.constant dense<0.000000e+00> : vector<256x64xf32>
    %19 = tpu.matmul %17, %18, %cst_21 {dimension_numbers = #tpu.dot_dimension_numbers<[1], [0], [0], [1], [0, 0, 1, 1], [], []>} : vector<256x36xbf16>, vector<36x64xbf16>, vector<256x64xf32> -> vector<256x64xf32>
    %20 = vector.broadcast %0 : vector<1x64xf32> to vector<256x64xf32>
    %21 = arith.mulf %19, %20 : vector<256x64xf32>
    %22 = vector.broadcast %1 : vector<1x64xf32> to vector<256x64xf32>
    %23 = arith.addf %21, %22 : vector<256x64xf32>
    %cst_22 = arith.constant 0.000000e+00 : f32
    %24 = vector.broadcast %cst_22 : f32 to vector<256x64xf32>
    %25 = arith.maximumf %23, %24 : vector<256x64xf32>
    %26 = vector.shape_cast %25 : vector<256x64xf32> to vector<16x16x64xf32>
    %cst_23 = arith.constant 0.000000e+00 : f32
    %27 = vector.broadcast %cst_23 : f32 to vector<16x1x64xf32>
    %28 = vector.extract_strided_slice %26 {offsets = [0, 0, 0], sizes = [16, 15, 64], strides = [1, 1, 1]} : vector<16x16x64xf32> to vector<16x15x64xf32>
    %29 = tpu.concatenate %27, %28 in 1 : vector<16x1x64xf32>, vector<16x15x64xf32> -> vector<16x16x64xf32>
    %30 = vector.extract_strided_slice %26 {offsets = [0, 1, 0], sizes = [16, 15, 64], strides = [1, 1, 1]} : vector<16x16x64xf32> to vector<16x15x64xf32>
    %31 = tpu.concatenate %30, %27 in 1 : vector<16x15x64xf32>, vector<16x1x64xf32> -> vector<16x16x64xf32>
    %32 = arith.truncf %29 : vector<16x16x64xf32> to vector<16x16x64xbf16>
    %c1 = arith.constant 1 : index
    %c0_24 = arith.constant 0 : index
    %c0_25 = arith.constant 0 : index
    %33 = vector.load %arg8[%c1, %c0_24, %c0_25] : memref<18x16x192xbf16, #tpu.memory_space<vmem>>, vector<16x16x64xbf16>
    tpu.vector_store %arg8[%c1, %c0_24, %c0_25], %32 {strides = array<i32>} : memref<18x16x192xbf16, #tpu.memory_space<vmem>>, vector<16x16x64xbf16>,
    %34 = arith.truncf %26 : vector<16x16x64xf32> to vector<16x16x64xbf16>
    %c1_26 = arith.constant 1 : index
    %c0_27 = arith.constant 0 : index
    %c64 = arith.constant 64 : index
    %35 = vector.load %arg8[%c1_26, %c0_27, %c64] : memref<18x16x192xbf16, #tpu.memory_space<vmem>>, vector<16x16x64xbf16>
    tpu.vector_store %arg8[%c1_26, %c0_27, %c64], %34 {strides = array<i32>} : memref<18x16x192xbf16, #tpu.memory_space<vmem>>, vector<16x16x64xbf16>,
    %36 = arith.truncf %31 : vector<16x16x64xf32> to vector<16x16x64xbf16>
    %c1_28 = arith.constant 1 : index
    %c0_29 = arith.constant 0 : index
    %c128 = arith.constant 128 : index
    %37 = vector.load %arg8[%c1_28, %c0_29, %c128] : memref<18x16x192xbf16, #tpu.memory_space<vmem>>, vector<16x16x64xbf16>
    tpu.vector_store %arg8[%c1_28, %c0_29, %c128], %36 {strides = array<i32>} : memref<18x16x192xbf16, #tpu.memory_space<vmem>>, vector<16x16x64xbf16>,
    %cst_30 = arith.constant 0.000000e+00 : f32
    %38 = vector.broadcast %cst_30 : f32 to vector<256x64xf32>
    %c0_31 = arith.constant 0 : index
    %c0_32 = arith.constant 0 : index
    %c0_33 = arith.constant 0 : index
    %39 = vector.load %arg8[%c0_31, %c0_32, %c0_33] : memref<18x16x192xbf16, #tpu.memory_space<vmem>>, vector<16x16x192xbf16>
    %40 = vector.shape_cast %39 : vector<16x16x192xbf16> to vector<256x192xbf16>
    %c0_34 = arith.constant 0 : index
    %c0_35 = arith.constant 0 : index
    %c0_36 = arith.constant 0 : index
    %41 = vector.load %arg3[%c0_34, %c0_35, %c0_36] : memref<3x192x64xbf16, #tpu.memory_space<vmem>>, vector<1x192x64xbf16>
    %42 = vector.shape_cast %41 : vector<1x192x64xbf16> to vector<192x64xbf16>
    %cst_37 = arith.constant dense<0.000000e+00> : vector<256x64xf32>
    %43 = tpu.matmul %40, %42, %cst_37 {dimension_numbers = #tpu.dot_dimension_numbers<[1], [0], [0], [1], [0, 0, 1, 1], [], []>} : vector<256x192xbf16>, vector<192x64xbf16>, vector<256x64xf32> -> vector<256x64xf32>
    %44 = arith.addf %38, %43 : vector<256x64xf32>
    %c1_38 = arith.constant 1 : index
    %c0_39 = arith.constant 0 : index
    %c0_40 = arith.constant 0 : index
    %45 = vector.load %arg8[%c1_38, %c0_39, %c0_40] : memref<18x16x192xbf16, #tpu.memory_space<vmem>>, vector<16x16x192xbf16>
    %46 = vector.shape_cast %45 : vector<16x16x192xbf16> to vector<256x192xbf16>
    %c1_41 = arith.constant 1 : index
    %c0_42 = arith.constant 0 : index
    %c0_43 = arith.constant 0 : index
    %47 = vector.load %arg3[%c1_41, %c0_42, %c0_43] : memref<3x192x64xbf16, #tpu.memory_space<vmem>>, vector<1x192x64xbf16>
    %48 = vector.shape_cast %47 : vector<1x192x64xbf16> to vector<192x64xbf16>
    %cst_44 = arith.constant dense<0.000000e+00> : vector<256x64xf32>
    %49 = tpu.matmul %46, %48, %cst_44 {dimension_numbers = #tpu.dot_dimension_numbers<[1], [0], [0], [1], [0, 0, 1, 1], [], []>} : vector<256x192xbf16>, vector<192x64xbf16>, vector<256x64xf32> -> vector<256x64xf32>
    %50 = arith.addf %44, %49 : vector<256x64xf32>
    %c2 = arith.constant 2 : index
    %c0_45 = arith.constant 0 : index
    %c0_46 = arith.constant 0 : index
    %51 = vector.load %arg8[%c2, %c0_45, %c0_46] : memref<18x16x192xbf16, #tpu.memory_space<vmem>>, vector<16x16x192xbf16>
    %52 = vector.shape_cast %51 : vector<16x16x192xbf16> to vector<256x192xbf16>
    %c2_47 = arith.constant 2 : index
    %c0_48 = arith.constant 0 : index
    %c0_49 = arith.constant 0 : index
    %53 = vector.load %arg3[%c2_47, %c0_48, %c0_49] : memref<3x192x64xbf16, #tpu.memory_space<vmem>>, vector<1x192x64xbf16>
    %54 = vector.shape_cast %53 : vector<1x192x64xbf16> to vector<192x64xbf16>
    %cst_50 = arith.constant dense<0.000000e+00> : vector<256x64xf32>
    %55 = tpu.matmul %52, %54, %cst_50 {dimension_numbers = #tpu.dot_dimension_numbers<[1], [0], [0], [1], [0, 0, 1, 1], [], []>} : vector<256x192xbf16>, vector<192x64xbf16>, vector<256x64xf32> -> vector<256x64xf32>
    %56 = arith.addf %50, %55 : vector<256x64xf32>
    %57 = vector.broadcast %0 : vector<1x64xf32> to vector<256x64xf32>
    %58 = arith.mulf %56, %57 : vector<256x64xf32>
    %59 = vector.broadcast %2 : vector<1x64xf32> to vector<256x64xf32>
    %60 = arith.addf %58, %59 : vector<256x64xf32>
    %cst_51 = arith.constant 0.000000e+00 : f32
    %61 = vector.broadcast %cst_51 : f32 to vector<256x64xf32>
    %62 = arith.maximumf %60, %61 : vector<256x64xf32>
    %63 = vector.shape_cast %62 : vector<256x64xf32> to vector<16x16x64xf32>
    %cst_52 = arith.constant 0.000000e+00 : f32
    %64 = vector.broadcast %cst_52 : f32 to vector<16x1x64xf32>
    %65 = vector.extract_strided_slice %63 {offsets = [0, 0, 0], sizes = [16, 15, 64], strides = [1, 1, 1]} : vector<16x16x64xf32> to vector<16x15x64xf32>
    %66 = tpu.concatenate %64, %65 in 1 : vector<16x1x64xf32>, vector<16x15x64xf32> -> vector<16x16x64xf32>
    %67 = vector.extract_strided_slice %63 {offsets = [0, 1, 0], sizes = [16, 15, 64], strides = [1, 1, 1]} : vector<16x16x64xf32> to vector<16x15x64xf32>
    %68 = tpu.concatenate %67, %64 in 1 : vector<16x15x64xf32>, vector<16x1x64xf32> -> vector<16x16x64xf32>
    %69 = arith.truncf %66 : vector<16x16x64xf32> to vector<16x16x64xbf16>
    %c1_53 = arith.constant 1 : index
    %c0_54 = arith.constant 0 : index
    %c0_55 = arith.constant 0 : index
    %70 = vector.load %arg9[%c1_53, %c0_54, %c0_55] : memref<18x16x192xbf16, #tpu.memory_space<vmem>>, vector<16x16x64xbf16>
    tpu.vector_store %arg9[%c1_53, %c0_54, %c0_55], %69 {strides = array<i32>} : memref<18x16x192xbf16, #tpu.memory_space<vmem>>, vector<16x16x64xbf16>,
    %71 = arith.truncf %63 : vector<16x16x64xf32> to vector<16x16x64xbf16>
    %c1_56 = arith.constant 1 : index
    %c0_57 = arith.constant 0 : index
    %c64_58 = arith.constant 64 : index
    %72 = vector.load %arg9[%c1_56, %c0_57, %c64_58] : memref<18x16x192xbf16, #tpu.memory_space<vmem>>, vector<16x16x64xbf16>
    tpu.vector_store %arg9[%c1_56, %c0_57, %c64_58], %71 {strides = array<i32>} : memref<18x16x192xbf16, #tpu.memory_space<vmem>>, vector<16x16x64xbf16>,
    %73 = arith.truncf %68 : vector<16x16x64xf32> to vector<16x16x64xbf16>
    %c1_59 = arith.constant 1 : index
    %c0_60 = arith.constant 0 : index
    %c128_61 = arith.constant 128 : index
    %74 = vector.load %arg9[%c1_59, %c0_60, %c128_61] : memref<18x16x192xbf16, #tpu.memory_space<vmem>>, vector<16x16x64xbf16>
    tpu.vector_store %arg9[%c1_59, %c0_60, %c128_61], %73 {strides = array<i32>} : memref<18x16x192xbf16, #tpu.memory_space<vmem>>, vector<16x16x64xbf16>,
    %cst_62 = arith.constant 0.000000e+00 : f32
    %75 = vector.broadcast %cst_62 : f32 to vector<256x64xf32>
    %c0_63 = arith.constant 0 : index
    %c0_64 = arith.constant 0 : index
    %c0_65 = arith.constant 0 : index
    %76 = vector.load %arg9[%c0_63, %c0_64, %c0_65] : memref<18x16x192xbf16, #tpu.memory_space<vmem>>, vector<16x16x192xbf16>
    %77 = vector.shape_cast %76 : vector<16x16x192xbf16> to vector<256x192xbf16>
    %c0_66 = arith.constant 0 : index
    %c0_67 = arith.constant 0 : index
    %c0_68 = arith.constant 0 : index
    %78 = vector.load %arg3[%c0_66, %c0_67, %c0_68] : memref<3x192x64xbf16, #tpu.memory_space<vmem>>, vector<1x192x64xbf16>
    %79 = vector.shape_cast %78 : vector<1x192x64xbf16> to vector<192x64xbf16>
    %cst_69 = arith.constant dense<0.000000e+00> : vector<256x64xf32>
    %80 = tpu.matmul %77, %79, %cst_69 {dimension_numbers = #tpu.dot_dimension_numbers<[1], [0], [0], [1], [0, 0, 1, 1], [], []>} : vector<256x192xbf16>, vector<192x64xbf16>, vector<256x64xf32> -> vector<256x64xf32>
    %81 = arith.addf %75, %80 : vector<256x64xf32>
    %c1_70 = arith.constant 1 : index
    %c0_71 = arith.constant 0 : index
    %c0_72 = arith.constant 0 : index
    %82 = vector.load %arg9[%c1_70, %c0_71, %c0_72] : memref<18x16x192xbf16, #tpu.memory_space<vmem>>, vector<16x16x192xbf16>
    %83 = vector.shape_cast %82 : vector<16x16x192xbf16> to vector<256x192xbf16>
    %c1_73 = arith.constant 1 : index
    %c0_74 = arith.constant 0 : index
    %c0_75 = arith.constant 0 : index
    %84 = vector.load %arg3[%c1_73, %c0_74, %c0_75] : memref<3x192x64xbf16, #tpu.memory_space<vmem>>, vector<1x192x64xbf16>
    %85 = vector.shape_cast %84 : vector<1x192x64xbf16> to vector<192x64xbf16>
    %cst_76 = arith.constant dense<0.000000e+00> : vector<256x64xf32>
    %86 = tpu.matmul %83, %85, %cst_76 {dimension_numbers = #tpu.dot_dimension_numbers<[1], [0], [0], [1], [0, 0, 1, 1], [], []>} : vector<256x192xbf16>, vector<192x64xbf16>, vector<256x64xf32> -> vector<256x64xf32>
    %87 = arith.addf %81, %86 : vector<256x64xf32>
    %c2_77 = arith.constant 2 : index
    %c0_78 = arith.constant 0 : index
    %c0_79 = arith.constant 0 : index
    %88 = vector.load %arg9[%c2_77, %c0_78, %c0_79] : memref<18x16x192xbf16, #tpu.memory_space<vmem>>, vector<16x16x192xbf16>
    %89 = vector.shape_cast %88 : vector<16x16x192xbf16> to vector<256x192xbf16>
    %c2_80 = arith.constant 2 : index
    %c0_81 = arith.constant 0 : index
    %c0_82 = arith.constant 0 : index
    %90 = vector.load %arg3[%c2_80, %c0_81, %c0_82] : memref<3x192x64xbf16, #tpu.memory_space<vmem>>, vector<1x192x64xbf16>
    %91 = vector.shape_cast %90 : vector<1x192x64xbf16> to vector<192x64xbf16>
    %cst_83 = arith.constant dense<0.000000e+00> : vector<256x64xf32>
    %92 = tpu.matmul %89, %91, %cst_83 {dimension_numbers = #tpu.dot_dimension_numbers<[1], [0], [0], [1], [0, 0, 1, 1], [], []>} : vector<256x192xbf16>, vector<192x64xbf16>, vector<256x64xf32> -> vector<256x64xf32>
    %93 = arith.addf %87, %92 : vector<256x64xf32>
    %94 = vector.broadcast %0 : vector<1x64xf32> to vector<256x64xf32>
    %95 = arith.mulf %93, %94 : vector<256x64xf32>
    %96 = vector.broadcast %2 : vector<1x64xf32> to vector<256x64xf32>
    %97 = arith.addf %95, %96 : vector<256x64xf32>
    %cst_84 = arith.constant 0.000000e+00 : f32
    %98 = vector.broadcast %cst_84 : f32 to vector<256x64xf32>
    %99 = arith.maximumf %97, %98 : vector<256x64xf32>
    %c0_85 = arith.constant 0 : index
    %c0_86 = arith.constant 0 : index
    %c0_87 = arith.constant 0 : index
    %100 = vector.load %arg7[%c0_85, %c0_86, %c0_87] : memref<1x256x64xf32, #tpu.memory_space<vmem>>, vector<1x256x64xf32>
    %101 = vector.shape_cast %100 : vector<1x256x64xf32> to vector<256x64xf32>
    %102 = vector.shape_cast %99 : vector<256x64xf32> to vector<1x256x64xf32>
    tpu.vector_store %arg7[%c0_85, %c0_86, %c0_87], %102 {strides = array<i32>} : memref<1x256x64xf32, #tpu.memory_space<vmem>>, vector<1x256x64xf32>,
    return
  }
  func.func @transform_0(%arg0: i32) -> (i32, i32, i32) {
    %c0_i32 = arith.constant 0 : i32
    %c0_i32_0 = arith.constant 0 : i32
    %c0_i32_1 = arith.constant 0 : i32
    return %arg0, %c0_i32, %c0_i32_0 : i32, i32, i32
  }
  func.func @transform_1(%arg0: i32) -> (i32, i32) {
    %c0_i32 = arith.constant 0 : i32
    %c0_i32_0 = arith.constant 0 : i32
    %c0_i32_1 = arith.constant 0 : i32
    return %c0_i32, %c0_i32_0 : i32, i32
  }
  func.func @transform_2(%arg0: i32) -> (i32, i32, i32) {
    %c0_i32 = arith.constant 0 : i32
    %c0_i32_0 = arith.constant 0 : i32
    %c0_i32_1 = arith.constant 0 : i32
    %c0_i32_2 = arith.constant 0 : i32
    return %c0_i32, %c0_i32_0, %c0_i32_1 : i32, i32, i32
  }
  func.func @transform_3(%arg0: i32) -> (i32, i32) {
    %c0_i32 = arith.constant 0 : i32
    %c0_i32_0 = arith.constant 0 : i32
    %c0_i32_1 = arith.constant 0 : i32
    return %c0_i32, %c0_i32_0 : i32, i32
  }
  func.func @transform_4(%arg0: i32) -> (i32, i32) {
    %c0_i32 = arith.constant 0 : i32
    %c0_i32_0 = arith.constant 0 : i32
    %c0_i32_1 = arith.constant 0 : i32
    return %c0_i32, %c0_i32_0 : i32, i32
  }
  func.func @transform_5(%arg0: i32) -> (i32, i32) {
    %c0_i32 = arith.constant 0 : i32
    %c0_i32_0 = arith.constant 0 : i32
    %c0_i32_1 = arith.constant 0 : i32
    return %c0_i32, %c0_i32_0 : i32, i32
  }
  func.func @transform_6(%arg0: i32) -> (i32, i32, i32) {
    %c0_i32 = arith.constant 0 : i32
    %c0_i32_0 = arith.constant 0 : i32
    %c0_i32_1 = arith.constant 0 : i32
    return %arg0, %c0_i32, %c0_i32_0 : i32, i32, i32
  }
}

</mosaic_0001>

<bundles_post_ra>
// kernel: map_forward.1
= control target key start
LH: loop header
LB: loop body
LE: loop exit
PB: predicated region body
PF: predicated region fallthrough
CT: control target
= control target key end

     0   :  { %11 = vsyncpa [#allocation5], 0  ;;  %s6448_s0 = inlined_call_operand.vmem [shape: bf16[2,256,36], index: 0, kind: input, shape index: {}]   ;;  %s6449_s1 = inlined_call_operand.vmem [shape: bf16[36,64], index: 1, kind: input, shape index: {}]   ;;  %s6450_s2 = inlined_call_operand.vmem [shape: bf16[3,192,64], index: 2, kind: input, shape index: {}]   ;;  %s6451_s3 = inlined_call_operand.vmem [shape: f32[1,64], index: 3, kind: input, shape index: {}]   ;;  %s6452_s4 = inlined_call_operand.vmem [shape: f32[1,64], index: 4, kind: input, shape index: {}]   ;;  %s6453_s5 = inlined_call_operand.vmem [shape: f32[1,64], index: 5, kind: input, shape index: {}]   ;;  %s6454_s6 = inlined_call_operand.hbm [shape: f32[2,256,64], index: 6, kind: output, shape index: {}]  }
   0x1   :  { %13 = vsyncpa [#allocation5 + $0x1], 0  ;;  %s4768_s21 = smov 0   ;;  %s4770_s22 = smov 0  }
   0x2   :  { %s4772_s23 = smov 0   ;;  %s4774_s24 = smov 0  }
   0x3 LB: > { %s4789_s25 = sadd.s32 4294967295, %s4726_s24   ;;  %s3888_s26 = sadd.s32 4294967294, %s4726_s24   ;;  %s4726_s24 = sphi %s4774_s24, %s6488_s24   ;;  %s4722_s23 = sphi %s4772_s23, %s6487_s23   ;;  %s4718_s22 = sphi %s4770_s22, %s6486_s22   ;;  %s4714_s21 = sphi %s4768_s21, %s6485_s21  }
   0x4   : > { %s4793_s27 = sadd.s32 1, %s4726_s24   ;;  %s157_s28 = sadd.s32 1, %s4722_s23 }
   0x5   : > { %s154_s29 = ssub.s32 %s4726_s24, %s4793_s27  ;;  %p167_p0 = scmp.ne.s32.totalorder %s4722_s23, %s4718_s22 }
   0x6   : > { %p155_p1 = scmp.eq.s32.totalorder %s154_s29, 0  ;;  %p168_p2 = scmp.eq.s32.totalorder %s4789_s25, 1 }
   0x7   : > { %p173_p3 = scmp.ne.s32.totalorder %s4718_s22, %s4714_s21  ;;  %p174_p4 = scmp.eq.s32.totalorder %s3888_s26, 1 }
   0x8   : > { %s4804_s30 = scalar_select %p155_p1, %s4722_s23, %s157_s28  }
   0x9   : > { %p4806_p5 = por %p168_p2, %p167_p0  ;;  %p4810_p6 = por %p174_p4, %p173_p3 }
   0xa   : > { %p3891_p7 = scmp.ge.s32.totalorder %s4726_s24, 1  ;;  %p215_p8 = scmp.lt.s32.totalorder %s4726_s24, 3 }
   0xc   : > { %p216_p9 = pnand %p3891_p7, %p215_p8 }
   0xd   : > { %v4568_v0 = vld [vmem:[%s6449_s1] sm:$0xff] (!%p216_p9)   ;;  %v4569_v1 = vld [vmem:[%s6449_s1 + $0x8] sm:$0xff] (!%p216_p9)   ;;  %p245_p10 = scmp.lt.s32.totalorder (!%p216_p9), %s4789_s25, 1  ;;  %v4570_v2 = vld [vmem:[%s6449_s1 + $0x10] ss:$0 sps:$4 sm:$0x33] (!%p216_p9)  }
   0xe   : > { %219 = sbr.rel (%p216_p9) target bundleno = 1586 (0x632), region = 44  ;;  %4223 = vmatprep.subr.bf16.mxu0 (!%p216_p9), %v4568_v0  ;;  %4261 = vmatprep.subr.bf16.mxu1 (!%p216_p9), %v4568_v0  ;;  %vm446_vm0 = vcmask (!%p216_p9), 1041408   ;;  %vm397_vm1 = vcmask (!%p216_p9), 293888   ;;  %vm255_vm2 = vcmask (!%p216_p9), 523264   ;;  %v4587_v20 = vld [vmem:[%s6450_s2 + $0x60] sm:$0xff] (!%p216_p9)   ;;  %v6455_v21 = vmov (!%p216_p9), 0  }
   0xf   : > { %4224 = vmatpush3.bf16.msra.mxu0 (!%p216_p9), %v4568_v0  ;;  %4264 = vmatpush3.bf16.msra.mxu1 (!%p216_p9), %v4568_v0  ;;  %v448_v4 = vsel (!%p216_p9), %vm446_vm0, %v4570_v2, 0  ;;  %254 = vst [vmem:[#allocation2] sm:$0xff] (!%p216_p9), %v6455_v21  ;;  %256 = vst.msk [vmem:[#allocation2 + $0x8] sm:$0xff] (!%p216_p9), %vm255_vm2, %v6455_v21  ;;  %v4588_v22 = vld [vmem:[%s6450_s2 + $0x68] sm:$0xff] (!%p216_p9)   ;;  %v4589_v23 = vld [vmem:[%s6450_s2 + $0x70] sm:$0xff] (!%p216_p9)   ;;  %vm848_vm3 = vcmask (!%p216_p9), 1046528  }
  0x10   : > { %4225 = vmatprep.subr.bf16.mxu0 (!%p216_p9), %v4569_v1  ;;  %4262 = vmatprep.subr.bf16.mxu1 (!%p216_p9), %v4569_v1  ;;  %259 = vst.msk [vmem:[#allocation2 + $0x118] sm:$0xff] (!%p216_p9), %vm255_vm2, %v6455_v21  ;;  %261 = vst.msk [vmem:[#allocation3 + $0x8] sm:$0xff] (!%p216_p9), %vm255_vm2, %v6455_v21  ;;  %v4590_v24 = vld [vmem:[%s6450_s2 + $0x78] sm:$0xff] (!%p216_p9)   ;;  %v4591_v25 = vld [vmem:[%s6450_s2 + $0x80] sm:$0xff] (!%p216_p9)   ;;  %s4729_s18 = smov (!%p216_p9), 64   ;;  %vm751_vm4 = vcmask (!%p216_p9), 1040384  }
  0x11   : > { %264 = vst.msk [vmem:[#allocation3 + $0x118] sm:$0xff] (!%p216_p9), %vm255_vm2, %v6455_v21  ;;  %v4592_v26 = vld [vmem:[%s6450_s2 + $0x88] sm:$0xff] (!%p216_p9)   ;;  %v4593_v27 = vld [vmem:[%s6450_s2 + $0x90] sm:$0xff] (!%p216_p9)   ;;  %v4594_v28 = vld [vmem:[%s6450_s2 + $0x98] sm:$0xff] (!%p216_p9)   ;;  %vm1058_vm5 = vcmask (!%p216_p9), 1048064   ;;  %s242_s12 = sand.u32 (!%p216_p9), 1, %s4718_s22  }
  0x12   : > { %v4595_v29 = vld [vmem:[%s6450_s2 + $0xa0] sm:$0xff] (!%p216_p9)   ;;  %v4596_v30 = vld [vmem:[%s6450_s2 + $0xa8] sm:$0xff] (!%p216_p9)   ;;  %v4597_v32 = vld [vmem:[%s6450_s2 + $0xb0] sm:$0xff] (!%p216_p9)   ;;  %s3892_s13 = sshll.u32 (!%p216_p9), %s242_s12, 8  ;;  %s4203_s20 = sshll.u32 (!%p216_p9), %s4789_s25, 12 }
  0x13   : > { %4226 = vmatpush3.bf16.msra.mxu0 (!%p216_p9), %v4569_v1  ;;  %4265 = vmatpush3.bf16.msra.mxu1 (!%p216_p9), %v4569_v1  ;;  %v4918_v31 = vld [vmem:[%s6451_s3] ss:$0 sm:$0xff] (!%p216_p9)  ;;  %v4598_v42 = vld [vmem:[%s6450_s2 + $0xb8] sm:$0xff] (!%p216_p9)   ;;  %s6397_s9 = scalar_lea.hbm (!%p216_p9), %s6454_s6, %s4203_s20  ;;  %s4730_s11 = smov (!%p216_p9), [#allocation4]  }
  0x14   : > { %4523 = vmatprep.subr.msk.bf16.mxu0 (!%p216_p9), %vm446_vm0, %v4570_v2  ;;  %4524 = vmatprep.subr.msk.bf16.mxu1 (!%p216_p9), %vm446_vm0, %v4570_v2  ;;  %v4926_v33 = vld [vmem:[%s6452_s4] ss:$0 sm:$0xff] (!%p216_p9) }
  0x15   : > { %s246_s15 = scalar_select %p245_p10, %s4789_s25, 1 }
  0x16   : > { %s6407_s25 = scalar_lea.sflag [#allocation5], %s242_s12 }
  0x17   : > { %s4202_s16 = sshll.u32 %s246_s15, 7  ;;  %4228 = vmatpush3.bf16.msra.mxu0 %v448_v4  ;;  %4266 = vmatpush3.bf16.msra.mxu1 %v448_v4 }
  0x18   : > { %s4830_s19 = scalar_lea.vmem %s6448_s0, %s4202_s16  ;;  %1340 = vmatprep.subr.bf16.mxu1 %v6455_v21  ;;  %2872 = vmatprep.subr.bf16.mxu0 %v6455_v21 }
  0x19   : > { %v4571_v3 = vld [vmem:[%s4830_s19] sm:$0xff]   ;;  %v4572_v5 = vld [vmem:[%s4830_s19 + $0x8] sm:$0xff]   ;;  %v4573_v6 = vld [vmem:[%s4830_s19 + $0x10] sm:$0xff]  }
  0x1a   : > { %4229 = vmatprep.mubr.msk.bf16.mxu0 %vm397_vm1, %v4571_v3  ;;  %v4574_v7 = vld [vmem:[%s4830_s19 + $0x18] sm:$0xff]   ;;  %v4575_v8 = vld [vmem:[%s4830_s19 + $0x20] sm:$0xff]   ;;  %v4584_v10 = vld [vmem:[%s4830_s19 + $0x68] sm:$0xff]  }
  0x1b   : > { %4230 = vmatmul.mubr.msk.bf16.vlgmr.msra.gmra.mrb[0].mxu0 %vm397_vm1, %v4572_v5  ;;  %v4583_v9 = vld [vmem:[%s4830_s19 + $0x60] sm:$0xff]   ;;  %v4585_v11 = vld [vmem:[%s4830_s19 + $0x70] sm:$0xff]   ;;  %v4576_v12 = vld [vmem:[%s4830_s19 + $0x28] sm:$0xff]  }
  0x1c   : > { %4233 = vmatprep.mubr.msk.bf16.mxu0 %vm397_vm1, %v4573_v6  ;;  %4253 = vmatprep.mubr.msk.bf16.mxu1 %vm397_vm1, %v4583_v9  ;;  %v4586_v13 = vld [vmem:[%s4830_s19 + $0x78] sm:$0xff]   ;;  %v4577_v14 = vld [vmem:[%s4830_s19 + $0x30] sm:$0xff]   ;;  %v4579_v16 = vld [vmem:[%s4830_s19 + $0x40] sm:$0xff]  }
  0x1d   : > { %4254 = vmatmul.mubr.msk.bf16.vlgmr.msra.gmra.mrb[0].mxu1 %vm397_vm1, %v4584_v10  ;;  %v4578_v15 = vld [vmem:[%s4830_s19 + $0x38] sm:$0xff]   ;;  %v4580_v17 = vld [vmem:[%s4830_s19 + $0x48] sm:$0xff]   ;;  %v4581_v18 = vld [vmem:[%s4830_s19 + $0x50] sm:$0xff]  }
  0x1e   : > { %4257 = vmatprep.mubr.msk.bf16.mxu1 %vm397_vm1, %v4585_v11  ;;  %v4582_v19 = vld [vmem:[%s4830_s19 + $0x58] sm:$0xff]   ;;  %1341 = vmatpush1.bf16.msra.mxu1 %v4587_v20  ;;  %s6270_s19 = scalar_lea.vmem [#allocation4], %s3892_s13 }
  0x1f   : > { %1342 = vmatprep.subr.bf16.mxu1 %v6455_v21  ;;  %s3826_s26 = sshll.u32 %s6270_s19, 4  ;;  %s6399_s26 = int_to_ptr.vmem [resolvable:$true] %s3826_s26 }
  0x20   : > { %s4664_s10 = scalar_lea.vmem %s6399_s26, 4096 }
  0x21   : > { %p4665_p11 = scmp.ne.s32.totalorder %s6399_s26, %s4664_s10 }
  0x22   : > { %1343 = vmatpush1.bf16.msra.mxu1 %v4588_v22 }
  0x23   : > { %4234 = vmatmul.mubr.msk.bf16.gmra.mrb[4].mxu0 %vm397_vm1, %v4574_v7  ;;  %1344 = vmatprep.subr.bf16.mxu1 %v6455_v21  ;;  %p4666_p12 = pnand %p4665_p11, %p4806_p5 }
  0x24   : > { %4237 = vmatprep.mubr.msk.bf16.mxu0 %vm397_vm1, %v4575_v8 }
  0x25   : > { %4258 = vmatmul.mubr.msk.bf16.gmra.mrb[4].mxu1 %vm397_vm1, %v4586_v13  ;;  %p4667_p13 = pneg %p4666_p12 }
  0x26   : > { %1345 = vmatpush1.bf16.msra.mxu1 %v4589_v23 }
  0x27   : > { %1346 = vmatprep.subr.bf16.mxu1 %v6455_v21 }
  0x2a   : > { %1347 = vmatpush1.bf16.msra.mxu1 %v4590_v24 }
  0x2b   : > { %4238 = vmatmul.mubr.msk.bf16.gmra.mrb[8].mxu0 %vm397_vm1, %v4576_v12  ;;  %1348 = vmatprep.subr.bf16.mxu1 %v6455_v21 }
  0x2c   : > { %4241 = vmatprep.mubr.msk.bf16.mxu0 %vm397_vm1, %v4577_v14 }
  0x2e   : > { %1349 = vmatpush1.bf16.msra.mxu1 %v4591_v25 }
  0x2f   : > { %1350 = vmatprep.subr.bf16.mxu1 %v6455_v21 }
  0x32   : > { %1351 = vmatpush1.bf16.msra.mxu1 %v4592_v26 }
  0x33   : > { %4242 = vmatmul.mubr.msk.bf16.gmra.mrb[12].mxu0 %vm397_vm1, %v4578_v15  ;;  %1352 = vmatprep.subr.bf16.mxu1 %v6455_v21 }
  0x34   : > { %4245 = vmatprep.mubr.msk.bf16.mxu0 %vm397_vm1, %v4579_v16 }
  0x36   : > { %1353 = vmatpush1.bf16.msra.mxu1 %v4593_v27 }
  0x37   : > { %1354 = vmatprep.subr.bf16.mxu1 %v6455_v21 }
  0x3a   : > { %1355 = vmatpush1.bf16.msra.mxu1 %v4594_v28 }
  0x3b   : > { %4246 = vmatmul.mubr.msk.bf16.gmra.mrb[16].mxu0 %vm397_vm1, %v4580_v17  ;;  %1356 = vmatprep.subr.bf16.mxu1 %v6455_v21 }
  0x3c   : > { %4249 = vmatprep.mubr.msk.bf16.mxu0 %vm397_vm1, %v4581_v18 }
  0x3e   : > { %1357 = vmatpush1.bf16.msra.mxu1 %v4595_v29 }
  0x3f   : > { %1358 = vmatprep.subr.bf16.mxu1 %v6455_v21 }
  0x42   : > { %1359 = vmatpush1.bf16.msra.mxu1 %v4596_v30 }
  0x43   : > { %4250 = vmatmul.mubr.msk.bf16.gmra.mrb[20].mxu0 %vm397_vm1, %v4582_v19  ;;  %1360 = vmatprep.subr.bf16.mxu1 %v6455_v21 }
  0x46   : > { %1361 = vmatpush1.bf16.msra.mxu1 %v4597_v32 }
  0x47   : > { %1362 = vmatprep.subr.bf16.mxu1 %v6455_v21 }
  0x4a   : > { %1363 = vmatpush1.bf16.msra.mxu1 %v4598_v42 }
  0x4b   : > { %1621 = vmatprep.subr.bf16.mxu1 %v6455_v21 }
  0xee   : > { %v4231_v34 = vpop.f32.mrb[0].mxu0 }
  0xef   : > { %v619_v35 = vmul.f32 %v4231_v34, %v4918_v31  ;;  %v484_v36 = vpop.f32.mrb[1].mxu0 }
  0xf0   : > { %v617_v37 = vmul.f32 %v4918_v31, %v484_v36  ;;  %v4232_v38 = vpop.f32.mrb[2].mxu0  ;;  %v4255_v56 = vpop.f32.mrb[0].mxu1 }
  0xf1   : > { %v657_v39 = vadd.f32 %v4926_v33, %v619_v35  ;;  %v620_v40 = vmul.f32 %v4232_v38, %v4918_v31  ;;  %v487_v41 = vpop.f32.mrb[3].mxu0  ;;  %v580_v62 = vpop.f32.mrb[1].mxu1  ;;  %v643_v20 = vmul.f32 %v4255_v56, %v4918_v31 }
  0xf2   : > { %v655_v43 = vadd.f32 %v4926_v33, %v617_v37  ;;  %v618_v44 = vmul.f32 %v4918_v31, %v487_v41  ;;  %v4256_v4 = vpop.f32.mrb[2].mxu1  ;;  %v641_v22 = vmul.f32 %v4918_v31, %v580_v62 }
  0xf3   : > { %v4938_v45 = vmax.f32 %v657_v39, 0.0  ;;  %v658_v46 = vadd.f32 %v4926_v33, %v620_v40  ;;  %v4967_v10 = vpop.f32.mrb[3].mxu1  ;;  %v4983_v23 = vmul.f32 %v4256_v4, %v4918_v31  ;;  %v681_v32 = vadd.f32 %v4926_v33, %v643_v20 }
  0xf4   : > { %v4941_v47 = vmax.f32 %v655_v43, 0.0  ;;  %v656_v48 = vadd.f32 %v4926_v33, %v618_v44  ;;  %v679_v34 = vadd.f32 %v4926_v33, %v641_v22 }
  0xf5   : > { %v755_v49 = vrot.slane %v4938_v45, 7  ;;  %v4946_v50 = vmax.f32 %v658_v46, 0.0  ;;  %v852_v51 = vrot.slane %v4938_v45, 1  ;;  %v5006_v46 = vmax.f32 %v681_v32, 0.0 }
  0xf6   : > { %v752_v52 = vrot.slane %v4941_v47, 7  ;;  %v849_v53 = vrot.slane %v4941_v47, 1  ;;  %v4951_v54 = vmax.f32 %v656_v48, 0.0  ;;  %v4235_v55 = vpop.f32.mrb[4].mxu0  ;;  %v5008_v48 = vmax.f32 %v679_v34, 0.0 }
  0xf7   : > { %v756_v57 = vrot.slane %v4946_v50, 7  ;;  %v853_v58 = vrot.slane %v4946_v50, 1  ;;  %v623_v59 = vmul.f32 %v4235_v55, %v4918_v31  ;;  %v500_v60 = vpop.f32.mrb[5].mxu0  ;;  %v979_v61 = vpack.c.bf16 %v4946_v50, %v4938_v45 }
  0xf8   : > { %v753_v63 = vrot.slane %v4951_v54, 7  ;;  %v850_v0 = vrot.slane %v4951_v54, 1  ;;  %v621_v1 = vmul.f32 %v4918_v31, %v500_v60  ;;  %v4236_v2 = vpop.f32.mrb[6].mxu0  ;;  %v978_v3 = vpack.c.bf16 %v4951_v54, %v4941_v47  ;;  %v4259_v35 = vpop.f32.mrb[4].mxu1 }
  0xf9   : > { %v854_v5 = vsel %vm848_vm3, %v852_v51, %v853_v58  ;;  %v930_v6 = vsel %vm848_vm3, %v853_v58, 0.0  ;;  %v661_v7 = vadd.f32 %v4926_v33, %v623_v59  ;;  %v624_v8 = vmul.f32 %v4236_v2, %v4918_v31  ;;  %v503_v9 = vpop.f32.mrb[7].mxu0  ;;  %v5002_v41 = vpop.f32.mrb[5].mxu1 }
  0xfa   : > { %v1076_v11 = vpack.c.bf16 %v930_v6, %v854_v5  ;;  %v851_v12 = vsel %vm848_vm3, %v849_v53, %v850_v0  ;;  %v929_v13 = vsel %vm848_vm3, %v850_v0, 0.0  ;;  %v659_v14 = vadd.f32 %v4926_v33, %v621_v1  ;;  %1010 = vrot.lane.b32.xlu0 %v978_v3, %s4729_s18  ;;  %v5010_v51 = vpop.f32.mrb[6].mxu1 }
  0xfb   : > { %v1075_v15 = vpack.c.bf16 %v929_v13, %v851_v12  ;;  %v4973_v16 = vmax.f32 %v661_v7, 0.0  ;;  %v662_v17 = vadd.f32 %v4926_v33, %v624_v8  ;;  %v622_v18 = vmul.f32 %v4918_v31, %v503_v9  ;;  %v5016_v60 = vpop.f32.mrb[7].mxu1 }
  0xfc   : > { %1092 = vst.msk [vmem:[#allocation2 + $0x28] sm:$0xff] %vm255_vm2, %v1076_v11  ;;  %v4978_v19 = vmax.f32 %v659_v14, 0.0  ;;  %v888_v14 = vrot.slane %v5006_v46, 1  ;;  %v885_v34 = vrot.slane %v5008_v48, 1 }
  0xfd   : > { %1091 = vst.msk [vmem:[#allocation2 + $0x18] sm:$0xff] %vm255_vm2, %v1075_v15  ;;  %v761_v24 = vrot.slane %v4973_v16, 7  ;;  %v858_v25 = vrot.slane %v4973_v16, 1  ;;  %v4988_v26 = vmax.f32 %v662_v17, 0.0  ;;  %v660_v27 = vadd.f32 %v4926_v33, %v622_v18 }
  0xfe   : > { %v758_v28 = vrot.slane %v4978_v19, 7  ;;  %v855_v29 = vrot.slane %v4978_v19, 1  ;;  %1012 = vrot.lane.b32.xlu0 %v979_v61, %s4729_s18  ;;  %v4239_v30 = vpop.f32.mrb[8].mxu0 }
  0xff   : > { %v762_v36 = vrot.slane %v4988_v26, 7  ;;  %v859_v37 = vrot.slane %v4988_v26, 1  ;;  %v4998_v38 = vmax.f32 %v660_v27, 0.0  ;;  %v981_v39 = vpack.c.bf16 %v4988_v26, %v4973_v16  ;;  %v516_v40 = vpop.f32.mrb[9].mxu0 }
 0x100   : > { %v627_v42 = vmul.f32 %v4239_v30, %v4918_v31  ;;  %v625_v43 = vmul.f32 %v4918_v31, %v516_v40  ;;  %v4240_v44 = vpop.f32.mrb[10].mxu0  ;;  %v834_v45 = vsel %vm751_vm4, 0.0, %v758_v28 }
 0x101   : > { %v860_v53 = vsel %vm848_vm3, %v858_v25, %v859_v37  ;;  %v932_v55 = vsel %vm848_vm3, %v859_v37, 0.0  ;;  %v759_v56 = vrot.slane %v4998_v38, 7  ;;  %v856_v58 = vrot.slane %v4998_v38, 1  ;;  %v519_v59 = vpop.f32.mrb[11].mxu0 }
 0x102   : > { %v1078_v61 = vpack.c.bf16 %v932_v55, %v860_v53  ;;  %v980_v62 = vpack.c.bf16 %v4998_v38, %v4978_v19  ;;  %v665_v0 = vadd.f32 %v4926_v33, %v627_v42  ;;  %v663_v1 = vadd.f32 %v4926_v33, %v625_v43 }
 0x103   : > { %v857_v2 = vsel %vm848_vm3, %v855_v29, %v856_v58  ;;  %v931_v3 = vsel %vm848_vm3, %v856_v58, 0.0  ;;  %v628_v4 = vmul.f32 %v4240_v44, %v4918_v31  ;;  %v626_v5 = vmul.f32 %v4918_v31, %v519_v59 }
 0x104   : > { %1094 = vst.msk [vmem:[#allocation2 + $0x48] sm:$0xff] %vm255_vm2, %v1078_v61  ;;  %v1077_v6 = vpack.c.bf16 %v931_v3, %v857_v2  ;;  %1014 = vrot.lane.b32.xlu1 %v980_v62, %s4729_s18  ;;  %v1164_v7 = vld [vmem:[#allocation2 + $0x18] sm:$0xff]  ;;  %v5028_v8 = vmax.f32 %v665_v0, 0.0  ;;  %v5030_v9 = vmax.f32 %v663_v1, 0.0  ;;  %v682_v42 = vadd.f32 %v4926_v33, %v4983_v23 }
 0x105   : > { %3968 = vmatprep.mubr.msk.bf16.mxu1 %vm255_vm2, %v1164_v7  ;;  %v666_v12 = vadd.f32 %v4926_v33, %v628_v4  ;;  %v664_v13 = vadd.f32 %v4926_v33, %v626_v5  ;;  %v642_v43 = vmul.f32 %v4918_v31, %v4967_v10  ;;  %v5056_v44 = vmul.f32 %v4259_v35, %v4918_v31 }
 0x106   : > { %1093 = vst.msk [vmem:[#allocation2 + $0x38] sm:$0xff] %vm255_vm2, %v1077_v6  ;;  %v767_v17 = vrot.slane %v5028_v8, 7  ;;  %v864_v18 = vrot.slane %v5028_v8, 1  ;;  %v764_v20 = vrot.slane %v5030_v9, 7  ;;  %v861_v22 = vrot.slane %v5030_v9, 1  ;;  %v4243_v25 = vpop.f32.mrb[12].mxu0 }
 0x107   : > { %v5043_v27 = vmax.f32 %v666_v12, 0.0  ;;  %v5045_v29 = vmax.f32 %v664_v13, 0.0  ;;  %v631_v30 = vmul.f32 %v4243_v25, %v4918_v31  ;;  %v532_v32 = vpop.f32.mrb[13].mxu0  ;;  %v5080_v13 = vmax.f32 %v682_v42, 0.0 }
 0x108   : > { %1016 = vrot.lane.b32.xlu1 %v981_v39, %s4729_s18  ;;  %v629_v37 = vmul.f32 %v4918_v31, %v532_v32  ;;  %v4244_v40 = vpop.f32.mrb[14].mxu0 }
 0x109   : > { %v768_v53 = vrot.slane %v5043_v27, 7  ;;  %v865_v55 = vrot.slane %v5043_v27, 1  ;;  %v862_v39 = vrot.slane %v5045_v29, 1  ;;  %v535_v59 = vpop.f32.mrb[15].mxu0  ;;  %v983_v61 = vpack.c.bf16 %v5043_v27, %v5028_v8 }
 0x10a   : > { %v982_v23 = vpack.c.bf16 %v5045_v29, %v5030_v9  ;;  %v669_v10 = vadd.f32 %v4926_v33, %v631_v30  ;;  %v667_v35 = vadd.f32 %v4926_v33, %v629_v37  ;;  %v632_v7 = vmul.f32 %v4244_v40, %v4918_v31 }
 0x10b   : > { %v866_v62 = vsel %vm848_vm3, %v864_v18, %v865_v55  ;;  %v934_v0 = vsel %vm848_vm3, %v865_v55, 0.0  ;;  %v863_v1 = vsel %vm848_vm3, %v861_v22, %v862_v39  ;;  %v933_v2 = vsel %vm848_vm3, %v862_v39, 0.0 }
 0x10c   : > { %v1080_v3 = vpack.c.bf16 %v934_v0, %v866_v62  ;;  %v1079_v4 = vpack.c.bf16 %v933_v2, %v863_v1  ;;  %1020 = vrot.lane.b32.xlu1 %v983_v61, %s4729_s18  ;;  %1018 = vrot.lane.b32.xlu0 %v982_v23, %s4729_s18  ;;  %v5074_v5 = vmax.f32 %v669_v10, 0.0  ;;  %v5076_v6 = vmax.f32 %v667_v35, 0.0 }
 0x10d   : > { %v630_v12 = vmul.f32 %v4918_v31, %v535_v59  ;;  %v680_v18 = vadd.f32 %v4926_v33, %v642_v43  ;;  %v670_v40 = vadd.f32 %v4926_v33, %v632_v7  ;;  %v889_v23 = vrot.slane %v5080_v13, 1 }
 0x10e   : > { %1096 = vst.msk [vmem:[#allocation2 + $0x68] sm:$0xff] %vm255_vm2, %v1080_v3  ;;  %1095 = vst.msk [vmem:[#allocation2 + $0x58] sm:$0xff] %vm255_vm2, %v1079_v4  ;;  %v870_v25 = vrot.slane %v5074_v5, 1  ;;  %v867_v32 = vrot.slane %v5076_v6, 1  ;;  %v4247_v37 = vpop.f32.mrb[16].mxu0  ;;  %v991_v35 = vpack.c.bf16 %v5080_v13, %v5006_v46  ;;  %v769_v16 = vsel %vm751_vm4, %v767_v17, %v768_v53 }
 0x10f   : > { %v668_v42 = vadd.f32 %v4926_v33, %v630_v12  ;;  %v635_v55 = vmul.f32 %v4247_v37, %v4918_v31  ;;  %v548_v43 = vpop.f32.mrb[17].mxu0  ;;  %v5095_v10 = vmax.f32 %v680_v18, 0.0  ;;  %v5099_v62 = vmax.f32 %v670_v40, 0.0 }
 0x110   : > { %v633_v59 = vmul.f32 %v4918_v31, %v548_v43  ;;  %v4248_v61 = vpop.f32.mrb[18].mxu0  ;;  %v890_v12 = vsel %vm848_vm3, %v888_v14, %v889_v23  ;;  %v942_v18 = vsel %vm848_vm3, %v889_v23, 0.0  ;;  %v6460_v8 = vrot.slane %v5074_v5, 7 }
 0x111   : > { %v5101_v0 = vmax.f32 %v668_v42, 0.0  ;;  %v673_v1 = vadd.f32 %v4926_v33, %v635_v55  ;;  %v636_v2 = vmul.f32 %v4248_v61, %v4918_v31  ;;  %v551_v3 = vpop.f32.mrb[19].mxu0  ;;  %v871_v40 = vrot.slane %v5099_v62, 1 }
 0x112   : > { %v671_v4 = vadd.f32 %v4926_v33, %v633_v59  ;;  %v634_v7 = vmul.f32 %v4918_v31, %v551_v3  ;;  %v985_v43 = vpack.c.bf16 %v5099_v62, %v5074_v5  ;;  %v886_v42 = vrot.slane %v5095_v10, 1 }
 0x113   : > { %v868_v55 = vrot.slane %v5101_v0, 1  ;;  %v984_v59 = vpack.c.bf16 %v5101_v0, %v5076_v6  ;;  %v5119_v61 = vmax.f32 %v673_v1, 0.0  ;;  %v872_v14 = vsel %vm848_vm3, %v870_v25, %v871_v40 }
 0x114   : > { %v5121_v3 = vmax.f32 %v671_v4, 0.0  ;;  %v936_v23 = vsel %vm848_vm3, %v871_v40, 0.0  ;;  %1024 = vrot.lane.b32.xlu1 %v985_v43, %s4729_s18  ;;  %v674_v40 = vadd.f32 %v4926_v33, %v636_v2  ;;  %v6461_v53 = vrot.slane %v5099_v62, 7 }
 0x115   : > { %v869_v21 = vsel %vm848_vm3, %v867_v32, %v868_v55  ;;  %v935_v15 = vsel %vm848_vm3, %v868_v55, 0.0  ;;  %v1082_v11 = vpack.c.bf16 %v936_v23, %v872_v14  ;;  %1022 = vrot.lane.b32.xlu0 %v984_v59, %s4729_s18  ;;  %v876_v1 = vrot.slane %v5119_v61, 1 }
 0x116   : > { %v1081_v39 = vpack.c.bf16 %v935_v15, %v869_v21  ;;  %v4251_v4 = vpop.f32.mrb[20].mxu0  ;;  %v873_v25 = vrot.slane %v5121_v3, 1  ;;  %v672_v32 = vadd.f32 %v4926_v33, %v634_v7  ;;  %v1088_v59 = vpack.c.bf16 %v942_v18, %v890_v12 }
 0x117   : > { %v564_v55 = vpop.f32.mrb[21].mxu0  ;;  %1098 = vst.msk [vmem:[#allocation2 + $0x88] sm:$0xff] %vm255_vm2, %v1082_v11  ;;  %v639_v21 = vmul.f32 %v4251_v4, %v4918_v31  ;;  %v5140_v23 = vmax.f32 %v674_v40, 0.0  ;;  %v990_v12 = vpack.c.bf16 %v5095_v10, %v5008_v48 }
 0x118   : > { %1097 = vst.msk [vmem:[#allocation2 + $0x78] sm:$0xff] %vm255_vm2, %v1081_v39  ;;  %v637_v15 = vmul.f32 %v4918_v31, %v564_v55  ;;  %v4252_v43 = vpop.f32.mrb[22].mxu0  ;;  %v5142_v30 = vmax.f32 %v672_v32, 0.0  ;;  %1104 = vst.msk [vmem:[#allocation2 + $0xe8] sm:$0xff] %vm255_vm2, %v1088_v59 }
 0x119   : > { %v640_v2 = vmul.f32 %v4252_v43, %v4918_v31  ;;  %v567_v7 = vpop.f32.mrb[23].mxu0  ;;  %v677_v11 = vadd.f32 %v4926_v33, %v639_v21  ;;  %v877_v40 = vrot.slane %v5140_v23, 1  ;;  %v987_v21 = vpack.c.bf16 %v5140_v23, %v5119_v61 }
 0x11a   : > { %v675_v39 = vadd.f32 %v4926_v33, %v637_v15  ;;  %v638_v4 = vmul.f32 %v4918_v31, %v567_v7  ;;  %v874_v55 = vrot.slane %v5142_v30, 1  ;;  %v986_v15 = vpack.c.bf16 %v5142_v30, %v5121_v3 }
 0x11b   : > { %v5160_v43 = vmax.f32 %v677_v11, 0.0  ;;  %v878_v7 = vsel %vm848_vm3, %v876_v1, %v877_v40  ;;  %v938_v14 = vsel %vm848_vm3, %v877_v40, 0.0  ;;  %1028 = vrot.lane.b32.xlu1 %v987_v21, %s4729_s18  ;;  %v678_v40 = vadd.f32 %v4926_v33, %v640_v2 }
 0x11c   : > { %v5162_v59 = vmax.f32 %v675_v39, 0.0  ;;  %v875_v18 = vsel %vm848_vm3, %v873_v25, %v874_v55  ;;  %v937_v32 = vsel %vm848_vm3, %v874_v55, 0.0  ;;  %v1084_v37 = vpack.c.bf16 %v938_v14, %v878_v7  ;;  %1026 = vrot.lane.b32.xlu0 %v986_v15, %s4729_s18 }
 0x11d   : > { %v1083_v22 = vpack.c.bf16 %v937_v32, %v875_v18  ;;  %v785_v58 = vrot.slane %v5160_v43, 7  ;;  %v882_v11 = vrot.slane %v5160_v43, 1  ;;  %v676_v25 = vadd.f32 %v4926_v33, %v638_v4 }
 0x11e   : > { %v879_v1 = vrot.slane %v5162_v59, 1  ;;  %1100 = vst.msk [vmem:[#allocation2 + $0xa8] sm:$0xff] %vm255_vm2, %v1084_v37  ;;  %v887_v14 = vsel %vm848_vm3, %v885_v34, %v886_v42  ;;  %v941_v18 = vsel %vm848_vm3, %v886_v42, 0.0  ;;  %v685_v32 = vadd.f32 %v4926_v33, %v5056_v44 }
 0x11f   : > { %1099 = vst.msk [vmem:[#allocation2 + $0x98] sm:$0xff] %vm255_vm2, %v1083_v22  ;;  %v645_v55 = vmul.f32 %v4918_v31, %v5002_v41  ;;  %v5186_v21 = vmax.f32 %v678_v40, 0.0  ;;  %v5188_v2 = vmax.f32 %v676_v25, 0.0  ;;  %v1087_v4 = vpack.c.bf16 %v941_v18, %v887_v14 }
 0x120   : > { %v648_v22 = vmul.f32 %v5010_v51, %v4918_v31  ;;  %v5192_v37 = vmax.f32 %v685_v32, 0.0  ;;  %v646_v42 = vmul.f32 %v4918_v31, %v5016_v60  ;;  %v832_v44 = vsel %vm751_vm4, 0.0, %v752_v52 }
 0x121   : > { %v683_v34 = vadd.f32 %v4926_v33, %v645_v55  ;;  %v883_v15 = vrot.slane %v5186_v21, 1  ;;  %v880_v40 = vrot.slane %v5188_v2, 1  ;;  %1103 = vst.msk [vmem:[#allocation2 + $0xd8] sm:$0xff] %vm255_vm2, %v1087_v4  ;;  %v989_v51 = vpack.c.bf16 %v5186_v21, %v5160_v43 }
 0x122   : > { %v988_v31 = vpack.c.bf16 %v5188_v2, %v5162_v59  ;;  %v894_v25 = vrot.slane %v5192_v37, 1  ;;  %v686_v60 = vadd.f32 %v4926_v33, %v648_v22  ;;  %v684_v41 = vadd.f32 %v4926_v33, %v646_v42 }
 0x123   : > { %v884_v14 = vsel %vm848_vm3, %v882_v11, %v883_v15  ;;  %v940_v18 = vsel %vm848_vm3, %v883_v15, 0.0  ;;  %v881_v32 = vsel %vm848_vm3, %v879_v1, %v880_v40  ;;  %v939_v55 = vsel %vm848_vm3, %v880_v40, 0.0  ;;  %1032 = vrot.lane.b32.xlu1 %v989_v51, %s4729_s18 }
 0x124   : > { %v1086_v7 = vpack.c.bf16 %v940_v18, %v884_v14  ;;  %v1085_v4 = vpack.c.bf16 %v939_v55, %v881_v32  ;;  %1030 = vrot.lane.b32.xlu0 %v988_v31, %s4729_s18  ;;  %v5217_v39 = vmax.f32 %v683_v34, 0.0  ;;  %v754_v11 = vsel %vm751_vm4, %v752_v52, %v753_v63 }
 0x125   : > { %v757_v1 = vsel %vm751_vm4, %v755_v49, %v756_v57  ;;  %v833_v34 = vsel %vm751_vm4, 0.0, %v755_v49  ;;  %v5238_v54 = vmax.f32 %v686_v60, 0.0  ;;  %v945_v52 = vpack.c.bf16 %v754_v11, %v832_v44 }
 0x126   : > { %1102 = vst.msk [vmem:[#allocation2 + $0xc8] sm:$0xff] %vm255_vm2, %v1086_v7  ;;  %1101 = vst.msk [vmem:[#allocation2 + $0xb8] sm:$0xff] %vm255_vm2, %v1085_v4  ;;  %v794_v33 = vrot.slane %v5217_v39, 7  ;;  %v891_v47 = vrot.slane %v5217_v39, 1  ;;  %v5240_v50 = vmax.f32 %v684_v41, 0.0  ;;  %v946_v63 = vpack.c.bf16 %v757_v1, %v833_v34 }
 0x127   : > { %v760_v49 = vsel %vm751_vm4, %v758_v28, %v759_v56  ;;  %1036 = vrot.lane.b32.xlu1 %v991_v35, %s4729_s18  ;;  %v798_v57 = vrot.slane %v5238_v54, 7  ;;  %v895_v22 = vrot.slane %v5238_v54, 1  ;;  %v993_v38 = vpack.c.bf16 %v5238_v54, %v5192_v37  ;;  %962 = vst.msk [vmem:[#allocation2 + $0x10] sm:$0xff] %vm255_vm2, %v945_v52 }
 0x128   : > { %1034 = vrot.lane.b32.xlu0 %v990_v12, %s4729_s18  ;;  %v947_v19 = vpack.c.bf16 %v760_v49, %v834_v45  ;;  %v795_v28 = vrot.slane %v5240_v50, 7  ;;  %v892_v56 = vrot.slane %v5240_v50, 1  ;;  %v992_v35 = vpack.c.bf16 %v5240_v50, %v5217_v39  ;;  %963 = vst.msk [vmem:[#allocation2 + $0x20] sm:$0xff] %vm255_vm2, %v946_v63  ;;  %v4599_v39 = vld [vmem:[%s6450_s2] sm:$0xff]  }
 0x129   : > { %v763_v12 = vsel %vm751_vm4, %v761_v24, %v762_v36  ;;  %v896_v42 = vsel %vm848_vm3, %v894_v25, %v895_v22  ;;  %v944_v44 = vsel %vm848_vm3, %v895_v22, 0.0  ;;  %v835_v41 = vsel %vm751_vm4, 0.0, %v761_v24 }
 0x12a   : > { %964 = vst.msk [vmem:[#allocation2 + $0x30] sm:$0xff] %vm255_vm2, %v947_v19  ;;  %v837_v15 = vsel %vm751_vm4, 0.0, %v767_v17  ;;  %v1090_v7 = vpack.c.bf16 %v944_v44, %v896_v42  ;;  %v893_v26 = vsel %vm848_vm3, %v891_v47, %v892_v56  ;;  %v943_v40 = vsel %vm848_vm3, %v892_v56, 0.0 }
 0x12b   : > { %v948_v36 = vpack.c.bf16 %v763_v12, %v835_v41  ;;  %v1089_v51 = vpack.c.bf16 %v943_v40, %v893_v26  ;;  %1040 = vrot.lane.b32.xlu1 %v993_v38, %s4729_s18  ;;  %v836_v24 = vsel %vm751_vm4, 0.0, %v764_v20  ;;  %v6459_v31 = vrot.slane %v5045_v29, 7 }
 0x12c   : > { %1038 = vrot.lane.b32.xlu0 %v992_v35, %s4729_s18  ;;  %1106 = vst.msk [vmem:[#allocation2 + $0x108] sm:$0xff] %vm255_vm2, %v1090_v7  ;;  %v950_v25 = vpack.c.bf16 %v769_v16, %v837_v15  ;;  %v839_v17 = vsel %vm751_vm4, 0.0, %v6460_v8  ;;  %v6462_v14 = vmov %v6460_v8  ;;  %v6464_v32 = vrot.slane %v5101_v0, 7 }
 0x12d   : > { %v766_v60 = vsel %vm751_vm4, %v764_v20, %v6459_v31  ;;  %965 = vst.msk [vmem:[#allocation2 + $0x40] sm:$0xff] %vm255_vm2, %v948_v36  ;;  %v775_v29 = vsel %vm751_vm4, %v6462_v14, %v6461_v53  ;;  %1105 = vst.msk [vmem:[#allocation2 + $0xf8] sm:$0xff] %vm255_vm2, %v1089_v51  ;;  %v6463_v20 = vrot.slane %v5076_v6, 7  ;;  %v6466_v11 = vrot.slane %v5119_v61, 7  ;;  %v4600_v31 = vld [vmem:[%s6450_s2 + $0x8] sm:$0xff]  }
 0x12e   : > { %v949_v27 = vpack.c.bf16 %v766_v60, %v836_v24  ;;  %v952_v9 = vpack.c.bf16 %v775_v29, %v839_v17  ;;  %967 = vst.msk [vmem:[#allocation2 + $0x60] sm:$0xff] %vm255_vm2, %v950_v25  ;;  %v6467_v1 = vrot.slane %v5140_v23, 7  ;;  %v6469_v0 = vrot.slane %v5121_v3, 7  ;;  %v5415_v17 = vld [vmem:[#allocation2 + $0x38] sm:$0xff] }
 0x12f   : > { %v838_v18 = vsel %vm751_vm4, 0.0, %v6463_v20  ;;  %v6465_v55 = vmov %v6463_v20  ;;  %v841_v62 = vsel %vm751_vm4, 0.0, %v6466_v11  ;;  %v6468_v34 = vmov %v6466_v11  ;;  %v4602_v29 = vld [vmem:[%s6450_s2 + $0x18] sm:$0xff]   ;;  %v4605_v11 = vld [vmem:[%s6450_s2 + $0x30] sm:$0xff]  }
 0x130   : > { %v772_v4 = vsel %vm751_vm4, %v6465_v55, %v6464_v32  ;;  %966 = vst.msk [vmem:[#allocation2 + $0x50] sm:$0xff] %vm255_vm2, %v949_v27  ;;  %v781_v47 = vsel %vm751_vm4, %v6468_v34, %v6467_v1  ;;  %v840_v6 = vsel %vm751_vm4, 0.0, %v6469_v0  ;;  %v6470_v54 = vrot.slane %v5142_v30, 7  ;;  %969 = vst.msk [vmem:[#allocation2 + $0x80] sm:$0xff] %vm255_vm2, %v952_v9  ;;  %v4601_v27 = vld [vmem:[%s6450_s2 + $0x10] sm:$0xff]   ;;  %v4603_v9 = vld [vmem:[%s6450_s2 + $0x20] sm:$0xff]  }
 0x131   : > { %v951_v5 = vpack.c.bf16 %v772_v4, %v838_v18  ;;  %v6471_v52 = vmov %v6469_v0  ;;  %v954_v63 = vpack.c.bf16 %v781_v47, %v841_v62  ;;  %v843_v61 = vsel %vm751_vm4, 0.0, %v785_v58  ;;  %v5432_v18 = vld [vmem:[#allocation2 + $0x48] sm:$0xff]  ;;  %v4606_v1 = vld [vmem:[%s6450_s2 + $0x38] sm:$0xff]   ;;  %v4607_v0 = vld [vmem:[%s6450_s2 + $0x40] sm:$0xff]  }
 0x132   : > { %v778_v50 = vsel %vm751_vm4, %v6471_v52, %v6470_v54  ;;  %v6472_v23 = vrot.slane %v5186_v21, 7  ;;  %v6473_v3 = vrot.slane %v5162_v59, 7  ;;  %v6474_v38 = vrot.slane %v5188_v2, 7  ;;  %v4604_v32 = vld [vmem:[%s6450_s2 + $0x28] sm:$0xff]  }
 0x133   : > { %v953_v45 = vpack.c.bf16 %v778_v50, %v840_v6  ;;  %968 = vst.msk [vmem:[#allocation2 + $0x70] sm:$0xff] %vm255_vm2, %v951_v5  ;;  %v6476_v35 = vrot.slane %v5080_v13, 7  ;;  %v6477_v21 = vrot.slane %v5006_v46, 7  ;;  %971 = vst.msk [vmem:[#allocation2 + $0xa0] sm:$0xff] %vm255_vm2, %v954_v63  ;;  %v6479_v2 = vrot.slane %v5095_v10, 7  ;;  %v5449_v5 = vld [vmem:[#allocation2 + $0x58] sm:$0xff] }
 0x134   : > { %v787_v49 = vsel %vm751_vm4, %v785_v58, %v6472_v23  ;;  %v842_v22 = vsel %vm751_vm4, 0.0, %v6473_v3  ;;  %v6475_v19 = vmov %v6473_v3  ;;  %v6480_v59 = vrot.slane %v5008_v48, 7  ;;  %v5466_v54 = vld [vmem:[#allocation2 + $0x68] sm:$0xff]  ;;  %v4610_v3 = vld [vmem:[%s6450_s2 + $0x58] sm:$0xff]  }
 0x135   : > { %v956_v30 = vpack.c.bf16 %v787_v49, %v843_v61  ;;  %v784_v56 = vsel %vm751_vm4, %v6475_v19, %v6474_v38  ;;  %v793_v43 = vsel %vm751_vm4, %v6477_v21, %v6476_v35  ;;  %970 = vst.msk [vmem:[#allocation2 + $0x90] sm:$0xff] %vm255_vm2, %v953_v45  ;;  %v6478_v12 = vmov %v6477_v21  ;;  %v4608_v52 = vld [vmem:[%s6450_s2 + $0x48] sm:$0xff]   ;;  %v4609_v45 = vld [vmem:[%s6450_s2 + $0x50] sm:$0xff]   ;;  %v5506_v21 = vld [vmem:[#allocation2 + $0x98] sm:$0xff] }
 0x136   : > { %v955_v58 = vpack.c.bf16 %v784_v56, %v842_v22  ;;  %v845_v42 = vsel %vm751_vm4, 0.0, %v6478_v12  ;;  %v790_v44 = vsel %vm751_vm4, %v6480_v59, %v6479_v2  ;;  %v6481_v13 = vmov %v6480_v59  ;;  %v5499_v56 = vld [vmem:[#allocation2 + $0x88] sm:$0xff] }
 0x137   : > { %v844_v41 = vsel %vm751_vm4, 0.0, %v6481_v13  ;;  %973 = vst.msk [vmem:[#allocation2 + $0xc0] sm:$0xff] %vm255_vm2, %v956_v30  ;;  %v958_v15 = vpack.c.bf16 %v793_v43, %v845_v42  ;;  %v6482_v26 = vrot.slane %v5192_v37, 7  ;;  %v796_v48 = vsel %vm751_vm4, %v794_v33, %v795_v28  ;;  %v5398_v28 = vld [vmem:[#allocation2 + $0x28] sm:$0xff]  ;;  %v5483_v30 = vld [vmem:[#allocation2 + $0x78] sm:$0xff] }
 0x138   : > { %v957_v7 = vpack.c.bf16 %v790_v44, %v844_v41  ;;  %972 = vst.msk [vmem:[#allocation2 + $0xb0] sm:$0xff] %vm255_vm2, %v955_v58  ;;  %v846_v51 = vsel %vm751_vm4, 0.0, %v794_v33  ;;  %v6484_v60 = vmov 0   ;;  %v5513_v58 = vld [vmem:[#allocation2 + $0xa8] sm:$0xff]  ;;  %v5520_v42 = vld [vmem:[#allocation2 + $0xb8] sm:$0xff] }
 0x139   : > { %v799_v46 = vsel %vm751_vm4, %v6482_v26, %v798_v57  ;;  %v6483_v40 = vmov %v6482_v26  ;;  %975 = vst.msk [vmem:[#allocation2 + $0xe0] sm:$0xff] %vm255_vm2, %v958_v15  ;;  %v959_v57 = vpack.c.bf16 %v796_v48, %v846_v51  ;;  %v5527_v59 = vld [vmem:[#allocation2 + $0xc8] sm:$0xff]  ;;  %v5534_v13 = vld [vmem:[#allocation2 + $0xd8] sm:$0xff]  ;;  %v4611_v48 = vld [vmem:[%s6450_s2 + $0xc0] sm:$0xff]  }
 0x13a   : > { %v847_v10 = vsel %vm751_vm4, 0.0, %v6483_v40  ;;  %974 = vst.msk [vmem:[#allocation2 + $0xd0] sm:$0xff] %vm255_vm2, %v957_v7  ;;  %v5541_v15 = vld [vmem:[#allocation2 + $0xe8] sm:$0xff]  ;;  %v5548_v26 = vld [vmem:[#allocation2 + $0xf8] sm:$0xff]  ;;  %v5566_v51 = vld [vmem:[#allocation2] sm:$0xff] }
 0x13b   : > { %v960_v36 = vpack.c.bf16 %v799_v46, %v847_v10  ;;  %976 = vst.msk [vmem:[#allocation2 + $0xf0] sm:$0xff] %vm255_vm2, %v959_v57  ;;  %v5555_v40 = vld [vmem:[#allocation2 + $0x108] sm:$0xff]  ;;  %v1110_v57 = vld [vmem:[#allocation2 + $0x18] sm:$0xff] }
 0x13c   : > { %v1108_v10 = vld [vmem:[#allocation2 + $0x8] sm:$0xff] }
 0x13d   : > { %977 = vst.msk [vmem:[#allocation2 + $0x100] sm:$0xff] %vm255_vm2, %v960_v36 }
 0x16c   : > { %v1011_v37 = vpop.permute.xlu0 %1010 }
 0x16d   : > { %1059 = vst.msk [vmem:[#allocation2 + $0x10] sm:$0xff] %vm1058_vm5, %v1011_v37  ;;  %v4612_v37 = vld [vmem:[%s6450_s2 + $0xc8] sm:$0xff]  }
 0x170   : > { %v1013_v16 = vpop.permute.xlu0 %1012 }
 0x171   : > { %1060 = vst.msk [vmem:[#allocation2 + $0x20] sm:$0xff] %vm1058_vm5, %v1013_v16  ;;  %v4613_v16 = vld [vmem:[%s6450_s2 + $0xd0] sm:$0xff]  }
 0x174   : > { %v5395_v33 = vld [vmem:[#allocation2 + $0x10] sm:$0xff] }
 0x175   : > { %1373 = vmatmul.mubr.bf16.vlgmr.msra.gmra.mrb[8].mxu1 %v5395_v33 }
 0x176   : > { %1622 = vmatpush1.bf16.msra.mxu1 %v4599_v39  ;;  %v1015_v24 = vpop.permute.xlu1 %1014  ;;  %3969 = vmatprep.mubr.msk.bf16.mxu1 %vm255_vm2, %v5398_v28  ;;  %v4614_v39 = vld [vmem:[%s6450_s2 + $0xd8] sm:$0xff]  }
 0x177   : > { %1061 = vst.msk [vmem:[#allocation2 + $0x30] sm:$0xff] %vm1058_vm5, %v1015_v24  ;;  %1623 = vmatprep.subr.bf16.mxu1 %v6484_v60  ;;  %v4615_v24 = vld [vmem:[%s6450_s2 + $0xe0] sm:$0xff]  }
 0x178   : > { %v5412_v8 = vld [vmem:[#allocation2 + $0x20] sm:$0xff] }
 0x17a   : > { %v1017_v25 = vpop.permute.xlu1 %1016  ;;  %1624 = vmatpush1.bf16.msra.mxu1 %v4600_v31  ;;  %v4617_v31 = vld [vmem:[%s6450_s2 + $0xf0] sm:$0xff]  }
 0x17b   : > { %1062 = vst.msk [vmem:[#allocation2 + $0x40] sm:$0xff] %vm1058_vm5, %v1017_v25  ;;  %1625 = vmatprep.subr.bf16.mxu1 %v6484_v60  ;;  %v4619_v25 = vld [vmem:[%s6450_s2 + $0x100] sm:$0xff]  }
 0x17d   : > { %1381 = vmatmul.mubr.bf16.gmra.mrb[12].mxu1 %v5412_v8 }
 0x17e   : > { %3970 = vmatprep.mubr.msk.bf16.mxu1 %vm255_vm2, %v5415_v17  ;;  %v1021_v53 = vpop.permute.xlu1 %1020  ;;  %v1019_v14 = vpop.permute.xlu0 %1018  ;;  %1626 = vmatpush1.bf16.msra.mxu1 %v4601_v27  ;;  %v5429_v20 = vld [vmem:[#allocation2 + $0x30] sm:$0xff]  ;;  %v4620_v27 = vld [vmem:[%s6450_s2 + $0x108] sm:$0xff]  }
 0x17f   : > { %1064 = vst.msk [vmem:[#allocation2 + $0x60] sm:$0xff] %vm1058_vm5, %v1021_v53  ;;  %1063 = vst.msk [vmem:[#allocation2 + $0x50] sm:$0xff] %vm1058_vm5, %v1019_v14  ;;  %1627 = vmatprep.subr.bf16.mxu1 %v6484_v60  ;;  %v4621_v53 = vld [vmem:[%s6450_s2 + $0x110] sm:$0xff]   ;;  %v4622_v14 = vld [vmem:[%s6450_s2 + $0x118] sm:$0xff]  }
 0x182   : > { %1628 = vmatpush1.bf16.msra.mxu1 %v4602_v29  ;;  %v5446_v62 = vld [vmem:[#allocation2 + $0x40] sm:$0xff]  ;;  %v4625_v29 = vld [vmem:[%s6450_s2 + $0x70] sm:$0xff]  }
 0x183   : > { %1629 = vmatprep.subr.bf16.mxu1 %v6484_v60 }
 0x185   : > { %1389 = vmatmul.mubr.bf16.gmra.mrb[16].mxu1 %v5429_v20 }
 0x186   : > { %3971 = vmatprep.mubr.msk.bf16.mxu1 %vm255_vm2, %v5432_v18  ;;  %1630 = vmatpush1.bf16.msra.mxu1 %v4603_v9  ;;  %v1025_v55 = vpop.permute.xlu1 %1024  ;;  %v5463_v6 = vld [vmem:[#allocation2 + $0x50] sm:$0xff]  ;;  %v5480_v61 = vld [vmem:[#allocation2 + $0x60] sm:$0xff]  ;;  %v4626_v9 = vld [vmem:[%s6450_s2 + $0x78] sm:$0xff]  }
 0x187   : > { %1631 = vmatprep.subr.bf16.mxu1 %v6484_v60  ;;  %v1023_v4 = vpop.permute.xlu0 %1022  ;;  %1066 = vst.msk [vmem:[#allocation2 + $0x80] sm:$0xff] %vm1058_vm5, %v1025_v55  ;;  %v4630_v55 = vld [vmem:[%s6450_s2 + $0x98] sm:$0xff]  }
 0x188   : > { %1065 = vst.msk [vmem:[#allocation2 + $0x70] sm:$0xff] %vm1058_vm5, %v1023_v4  ;;  %v5738_v4 = vld [vmem:[%s6453_s5] ss:$0 sm:$0xff] }
 0x18a   : > { %1632 = vmatpush1.bf16.msra.mxu1 %v4604_v32  ;;  %v4629_v32 = vld [vmem:[%s6450_s2 + $0x90] sm:$0xff]  }
 0x18b   : > { %1633 = vmatprep.subr.bf16.mxu1 %v6484_v60 }
 0x18d   : > { %1397 = vmatmul.mubr.bf16.gmra.mrb[20].mxu1 %v5446_v62  ;;  %v1029_v34 = vpop.permute.xlu1 %1028 }
 0x18e   : > { %3972 = vmatprep.mubr.msk.bf16.mxu1 %vm255_vm2, %v5449_v5  ;;  %1634 = vmatpush1.bf16.msra.mxu1 %v4605_v11  ;;  %v1027_v47 = vpop.permute.xlu0 %1026  ;;  %1068 = vst.msk [vmem:[#allocation2 + $0xa0] sm:$0xff] %vm1058_vm5, %v1029_v34  ;;  %v5503_v35 = vld [vmem:[#allocation2 + $0x80] sm:$0xff] }
 0x18f   : > { %1635 = vmatprep.subr.bf16.mxu1 %v6484_v60  ;;  %1067 = vst.msk [vmem:[#allocation2 + $0x90] sm:$0xff] %vm1058_vm5, %v1027_v47  ;;  %v5496_v19 = vld [vmem:[#allocation2 + $0x70] sm:$0xff] }
 0x192   : > { %1636 = vmatpush1.bf16.msra.mxu1 %v4606_v1 }
 0x193   : > { %1637 = vmatprep.subr.bf16.mxu1 %v6484_v60 }
 0x195   : > { %1405 = vmatmul.mubr.bf16.gmra.mrb[24].mxu1 %v5463_v6  ;;  %v1033_v50 = vpop.permute.xlu1 %1032  ;;  %v5517_v12 = vld [vmem:[#allocation2 + $0xa0] sm:$0xff] }
 0x196   : > { %3973 = vmatprep.mubr.msk.bf16.mxu1 %vm255_vm2, %v5466_v54  ;;  %1638 = vmatpush1.bf16.msra.mxu1 %v4607_v0  ;;  %v1031_v63 = vpop.permute.xlu0 %1030  ;;  %1070 = vst.msk [vmem:[#allocation2 + $0xc0] sm:$0xff] %vm1058_vm5, %v1033_v50  ;;  %v5510_v43 = vld [vmem:[#allocation2 + $0x90] sm:$0xff] }
 0x197   : > { %1639 = vmatprep.subr.bf16.mxu1 %v6484_v60  ;;  %1069 = vst.msk [vmem:[#allocation2 + $0xb0] sm:$0xff] %vm1058_vm5, %v1031_v63  ;;  %v4632_v63 = vld [vmem:[%s6450_s2 + $0xa8] sm:$0xff]  }
 0x199   : > { %v1037_v23 = vpop.permute.xlu1 %1036 }
 0x19a   : > { %1640 = vmatpush1.bf16.msra.mxu1 %v4608_v52  ;;  %v1035_v49 = vpop.permute.xlu0 %1034  ;;  %1072 = vst.msk [vmem:[#allocation2 + $0xe0] sm:$0xff] %vm1058_vm5, %v1037_v23 }
 0x19b   : > { %1641 = vmatprep.subr.bf16.mxu1 %v6484_v60  ;;  %1071 = vst.msk [vmem:[#allocation2 + $0xd0] sm:$0xff] %vm1058_vm5, %v1035_v49 }
 0x19d   : > { %1413 = vmatmul.mubr.bf16.gmra.mrb[28].mxu1 %v5480_v61  ;;  %v1041_v22 = vpop.permute.xlu1 %1040  ;;  %v5531_v44 = vld [vmem:[#allocation2 + $0xc0] sm:$0xff] }
 0x19e   : > { %3974 = vmatprep.mubr.msk.bf16.mxu1 %vm255_vm2, %v5483_v30  ;;  %1642 = vmatpush1.bf16.msra.mxu1 %v4609_v45  ;;  %v1039_v38 = vpop.permute.xlu0 %1038  ;;  %1074 = vst.msk [vmem:[#allocation2 + $0x100] sm:$0xff] %vm1058_vm5, %v1041_v22  ;;  %v5524_v2 = vld [vmem:[#allocation2 + $0xb0] sm:$0xff] }
 0x19f   : > { %1643 = vmatprep.subr.bf16.mxu1 %v6484_v60  ;;  %1073 = vst.msk [vmem:[#allocation2 + $0xf0] sm:$0xff] %vm1058_vm5, %v1039_v38 }
 0x1a1   : > { %v5545_v7 = vld [vmem:[#allocation2 + $0xe0] sm:$0xff] }
 0x1a2   : > { %1644 = vmatpush1.bf16.msra.mxu1 %v4610_v3  ;;  %v5538_v41 = vld [vmem:[#allocation2 + $0xd0] sm:$0xff] }
 0x1a3   : > { %1960 = vmatprep.subr.bf16.mxu1 %v6484_v60  ;;  %v4618_v60 = vld [vmem:[%s6450_s2 + $0xf8] sm:$0xff]  }
 0x1a5   : > { %1421 = vmatmul.mubr.bf16.gmra.mrb[32].mxu1 %v5496_v19  ;;  %v5559_v36 = vld [vmem:[#allocation2 + $0x100] sm:$0xff] }
 0x1a6   : > { %3975 = vmatprep.mubr.msk.bf16.mxu1 %vm255_vm2, %v5499_v56  ;;  %v5552_v46 = vld [vmem:[#allocation2 + $0xf0] sm:$0xff] }
 0x1ad   : > { %1429 = vmatmul.mubr.bf16.gmra.mrb[36].mxu1 %v5503_v35 }
 0x1ae   : > { %3976 = vmatprep.mubr.msk.bf16.mxu1 %vm255_vm2, %v5506_v21 }
 0x1b5   : > { %1437 = vmatmul.mubr.bf16.gmra.mrb[40].mxu1 %v5510_v43 }
 0x1b6   : > { %3977 = vmatprep.mubr.msk.bf16.mxu1 %vm255_vm2, %v5513_v58 }
 0x1bd   : > { %1445 = vmatmul.mubr.bf16.gmra.mrb[44].mxu1 %v5517_v12 }
 0x1be   : > { %3978 = vmatprep.mubr.msk.bf16.mxu1 %vm255_vm2, %v5520_v42 }
 0x1c5   : > { %1453 = vmatmul.mubr.bf16.gmra.mrb[48].mxu1 %v5524_v2 }
 0x1c6   : > { %3979 = vmatprep.mubr.msk.bf16.mxu1 %vm255_vm2, %v5527_v59 }
 0x1cd   : > { %1461 = vmatmul.mubr.bf16.gmra.mrb[52].mxu1 %v5531_v44 }
 0x1ce   : > { %3980 = vmatprep.mubr.msk.bf16.mxu1 %vm255_vm2, %v5534_v13 }
 0x1d5   : > { %1469 = vmatmul.mubr.bf16.gmra.mrb[56].mxu1 %v5538_v41 }
 0x1d6   : > { %3981 = vmatprep.mubr.msk.bf16.mxu1 %vm255_vm2, %v5541_v15 }
 0x1dd   : > { %1477 = vmatmul.mubr.bf16.gmra.mrb[60].mxu1 %v5545_v7 }
 0x1de   : > { %3982 = vmatprep.mubr.msk.bf16.mxu1 %vm255_vm2, %v5548_v26 }
 0x1e5   : > { %1485 = vmatmul.mubr.bf16.gmra.mrb[64].mxu1 %v5552_v46 }
 0x1e6   : > { %3983 = vmatprep.mubr.msk.bf16.mxu1 %vm255_vm2, %v5555_v40 }
 0x1ed   : > { %1493 = vmatmul.mubr.bf16.gmra.mrb[68].mxu1 %v5559_v36 }
 0x1ee   : > { %3996 = vmatprep.mubr.msk.bf16.mxu1 %vm255_vm2, %v1108_v10 }
 0x1f5   : > { %1654 = vmatmul.mubr.bf16.vlgmr.msra.gmra.mrb[8].mxu1 %v5566_v51 }
 0x1f6   : > { %1961 = vmatpush1.bf16.msra.mxu1 %v4611_v48  ;;  %3997 = vmatprep.mubr.msk.bf16.mxu1 %vm255_vm2, %v1110_v57 }
 0x1f7   : > { %1962 = vmatprep.subr.bf16.mxu1 %v5566_v51 }
 0x1fa   : > { %1963 = vmatpush1.bf16.msra.mxu1 %v4612_v37 }
 0x1fb   : > { %1964 = vmatprep.subr.bf16.mxu1 %v5566_v51 }
 0x1fd   : > { %1662 = vmatmul.mubr.bf16.gmra.mrb[12].mxu1 %v5395_v33  ;;  %v4616_v33 = vld [vmem:[%s6450_s2 + $0xe8] sm:$0xff]  }
 0x1fe   : > { %3998 = vmatprep.mubr.msk.bf16.mxu1 %vm255_vm2, %v5398_v28  ;;  %1965 = vmatpush1.bf16.msra.mxu1 %v4613_v16 }
 0x1ff   : > { %1966 = vmatprep.subr.bf16.mxu1 %v5566_v51 }
 0x202   : > { %1967 = vmatpush1.bf16.msra.mxu1 %v4614_v39 }
 0x203   : > { %1968 = vmatprep.subr.bf16.mxu1 %v5566_v51 }
 0x205   : > { %1670 = vmatmul.mubr.bf16.gmra.mrb[16].mxu1 %v5412_v8 }
 0x206   : > { %3999 = vmatprep.mubr.msk.bf16.mxu1 %vm255_vm2, %v5415_v17  ;;  %1969 = vmatpush1.bf16.msra.mxu1 %v4615_v24 }
 0x207   : > { %1970 = vmatprep.subr.bf16.mxu1 %v5566_v51 }
 0x20a   : > { %1971 = vmatpush1.bf16.msra.mxu1 %v4616_v33 }
 0x20b   : > { %1972 = vmatprep.subr.bf16.mxu1 %v5566_v51 }
 0x20d   : > { %1678 = vmatmul.mubr.bf16.gmra.mrb[20].mxu1 %v5429_v20 }
 0x20e   : > { %4000 = vmatprep.mubr.msk.bf16.mxu1 %vm255_vm2, %v5432_v18  ;;  %1973 = vmatpush1.bf16.msra.mxu1 %v4617_v31 }
 0x20f   : > { %1974 = vmatprep.subr.bf16.mxu1 %v5566_v51 }
 0x212   : > { %1975 = vmatpush1.bf16.msra.mxu1 %v4618_v60 }
 0x213   : > { %1976 = vmatprep.subr.bf16.mxu1 %v5566_v51 }
 0x215   : > { %1686 = vmatmul.mubr.bf16.gmra.mrb[24].mxu1 %v5446_v62 }
 0x216   : > { %4001 = vmatprep.mubr.msk.bf16.mxu1 %vm255_vm2, %v5449_v5  ;;  %1977 = vmatpush1.bf16.msra.mxu1 %v4619_v25 }
 0x217   : > { %1978 = vmatprep.subr.bf16.mxu1 %v5566_v51 }
 0x21a   : > { %1979 = vmatpush1.bf16.msra.mxu1 %v4620_v27 }
 0x21b   : > { %1980 = vmatprep.subr.bf16.mxu1 %v5566_v51 }
 0x21d   : > { %1694 = vmatmul.mubr.bf16.gmra.mrb[28].mxu1 %v5463_v6 }
 0x21e   : > { %4002 = vmatprep.mubr.msk.bf16.mxu1 %vm255_vm2, %v5466_v54  ;;  %1981 = vmatpush1.bf16.msra.mxu1 %v4621_v53 }
 0x21f   : > { %1982 = vmatprep.subr.bf16.mxu1 %v5566_v51 }
 0x222   : > { %1983 = vmatpush1.bf16.msra.mxu1 %v4622_v14 }
 0x225   : > { %1702 = vmatmul.mubr.bf16.gmra.mrb[32].mxu1 %v5480_v61 }
 0x226   : > { %4003 = vmatprep.mubr.msk.bf16.mxu1 %vm255_vm2, %v5483_v30 }
 0x22d   : > { %1710 = vmatmul.mubr.bf16.gmra.mrb[36].mxu1 %v5496_v19 }
 0x22e   : > { %4004 = vmatprep.mubr.msk.bf16.mxu1 %vm255_vm2, %v5499_v56 }
 0x235   : > { %1718 = vmatmul.mubr.bf16.gmra.mrb[40].mxu1 %v5503_v35 }
 0x236   : > { %4005 = vmatprep.mubr.msk.bf16.mxu1 %vm255_vm2, %v5506_v21 }
 0x23d   : > { %1726 = vmatmul.mubr.bf16.gmra.mrb[44].mxu1 %v5510_v43 }
 0x23e   : > { %4006 = vmatprep.mubr.msk.bf16.mxu1 %vm255_vm2, %v5513_v58 }
 0x245   : > { %1734 = vmatmul.mubr.bf16.gmra.mrb[48].mxu1 %v5517_v12 }
 0x246   : > { %4007 = vmatprep.mubr.msk.bf16.mxu1 %vm255_vm2, %v5520_v42 }
 0x24d   : > { %1742 = vmatmul.mubr.bf16.gmra.mrb[52].mxu1 %v5524_v2 }
 0x24e   : > { %4008 = vmatprep.mubr.msk.bf16.mxu1 %vm255_vm2, %v5527_v59 }
 0x255   : > { %1750 = vmatmul.mubr.bf16.gmra.mrb[56].mxu1 %v5531_v44 }
 0x256   : > { %4009 = vmatprep.mubr.msk.bf16.mxu1 %vm255_vm2, %v5534_v13 }
 0x25d   : > { %1758 = vmatmul.mubr.bf16.gmra.mrb[60].mxu1 %v5538_v41 }
 0x25e   : > { %4010 = vmatprep.mubr.msk.bf16.mxu1 %vm255_vm2, %v5541_v15 }
 0x265   : > { %1766 = vmatmul.mubr.bf16.gmra.mrb[64].mxu1 %v5545_v7 }
 0x266   : > { %4011 = vmatprep.mubr.msk.bf16.mxu1 %vm255_vm2, %v5548_v26 }
 0x26d   : > { %1774 = vmatmul.mubr.bf16.gmra.mrb[68].mxu1 %v5552_v46 }
 0x26e   : > { %4048 = vmatprep.mubr.msk.bf16.mxu1 %vm255_vm2, %v5398_v28  ;;  %v1814_v28 = vld [vmem:[#allocation2 + $0x118] sm:$0xff] }
 0x275   : > { %1993 = vmatmul.mubr.bf16.vlgmr.msra.gmra.mrb[8].mxu1 %v5412_v8  ;;  %v4623_v8 = vld [vmem:[%s6450_s2 + $0x60] sm:$0xff]  }
 0x276   : > { %4049 = vmatprep.mubr.msk.bf16.mxu1 %vm255_vm2, %v5415_v17  ;;  %2873 = vmatpush1.bf16.msra.mxu0 %v4623_v8  ;;  %v4624_v17 = vld [vmem:[%s6450_s2 + $0x68] sm:$0xff]  }
 0x277   : > { %2874 = vmatprep.subr.bf16.mxu0 %v5566_v51 }
 0x27a   : > { %2875 = vmatpush1.bf16.msra.mxu0 %v4624_v17 }
 0x27b   : > { %2876 = vmatprep.subr.bf16.mxu0 %v5566_v51 }
 0x27d   : > { %2001 = vmatmul.mubr.bf16.gmra.mrb[12].mxu1 %v5429_v20  ;;  %v4627_v20 = vld [vmem:[%s6450_s2 + $0x80] sm:$0xff]  }
 0x27e   : > { %4050 = vmatprep.mubr.msk.bf16.mxu1 %vm255_vm2, %v5432_v18  ;;  %2877 = vmatpush1.bf16.msra.mxu0 %v4625_v29  ;;  %v4628_v18 = vld [vmem:[%s6450_s2 + $0x88] sm:$0xff]  }
 0x27f   : > { %2878 = vmatprep.subr.bf16.mxu0 %v5566_v51 }
 0x282   : > { %2879 = vmatpush1.bf16.msra.mxu0 %v4626_v9 }
 0x283   : > { %2880 = vmatprep.subr.bf16.mxu0 %v5566_v51 }
 0x285   : > { %2009 = vmatmul.mubr.bf16.gmra.mrb[16].mxu1 %v5446_v62  ;;  %v4631_v62 = vld [vmem:[%s6450_s2 + $0xa0] sm:$0xff]  }
 0x286   : > { %4051 = vmatprep.mubr.msk.bf16.mxu1 %vm255_vm2, %v5449_v5  ;;  %2881 = vmatpush1.bf16.msra.mxu0 %v4627_v20  ;;  %v5746_v5 = vld [vmem:[%s6451_s3] ss:$0 sm:$0xff] }
 0x287   : > { %2882 = vmatprep.subr.bf16.mxu0 %v5566_v51 }
 0x28a   : > { %2883 = vmatpush1.bf16.msra.mxu0 %v4628_v18 }
 0x28b   : > { %2884 = vmatprep.subr.bf16.mxu0 %v5566_v51 }
 0x28d   : > { %2017 = vmatmul.mubr.bf16.gmra.mrb[20].mxu1 %v5463_v6 }
 0x28e   : > { %4052 = vmatprep.mubr.msk.bf16.mxu1 %vm255_vm2, %v5466_v54  ;;  %2885 = vmatpush1.bf16.msra.mxu0 %v4629_v32 }
 0x28f   : > { %2886 = vmatprep.subr.bf16.mxu0 %v5566_v51 }
 0x292   : > { %2887 = vmatpush1.bf16.msra.mxu0 %v4630_v55 }
 0x293   : > { %2888 = vmatprep.subr.bf16.mxu0 %v5566_v51 }
 0x295   : > { %2025 = vmatmul.mubr.bf16.gmra.mrb[24].mxu1 %v5480_v61 }
 0x296   : > { %4053 = vmatprep.mubr.msk.bf16.mxu1 %vm255_vm2, %v5483_v30  ;;  %2889 = vmatpush1.bf16.msra.mxu0 %v4631_v62  ;;  %v4633_v30 = vld [vmem:[%s6450_s2 + $0xb0] sm:$0xff]  }
 0x297   : > { %2890 = vmatprep.subr.bf16.mxu0 %v5566_v51 }
 0x29a   : > { %2891 = vmatpush1.bf16.msra.mxu0 %v4632_v63 }
 0x29b   : > { %2892 = vmatprep.subr.bf16.mxu0 %v5566_v51 }
 0x29d   : > { %2033 = vmatmul.mubr.bf16.gmra.mrb[28].mxu1 %v5496_v19 }
 0x29e   : > { %4054 = vmatprep.mubr.msk.bf16.mxu1 %vm255_vm2, %v5499_v56  ;;  %2893 = vmatpush1.bf16.msra.mxu0 %v4633_v30 }
 0x29f   : > { %2894 = vmatprep.subr.bf16.mxu0 %v5566_v51 }
 0x2a5   : > { %2041 = vmatmul.mubr.bf16.gmra.mrb[32].mxu1 %v5503_v35 }
 0x2a6   : > { %4055 = vmatprep.mubr.msk.bf16.mxu1 %vm255_vm2, %v5506_v21 }
 0x2ad   : > { %2049 = vmatmul.mubr.bf16.gmra.mrb[36].mxu1 %v5510_v43 }
 0x2ae   : > { %4056 = vmatprep.mubr.msk.bf16.mxu1 %vm255_vm2, %v5513_v58 }
 0x2b5   : > { %2057 = vmatmul.mubr.bf16.gmra.mrb[40].mxu1 %v5517_v12 }
 0x2b6   : > { %4057 = vmatprep.mubr.msk.bf16.mxu1 %vm255_vm2, %v5520_v42 }
 0x2bd   : > { %2065 = vmatmul.mubr.bf16.gmra.mrb[44].mxu1 %v5524_v2 }
 0x2be   : > { %4058 = vmatprep.mubr.msk.bf16.mxu1 %vm255_vm2, %v5527_v59 }
 0x2c5   : > { %2073 = vmatmul.mubr.bf16.gmra.mrb[48].mxu1 %v5531_v44 }
 0x2c6   : > { %4059 = vmatprep.mubr.msk.bf16.mxu1 %vm255_vm2, %v5534_v13  ;;  %v4634_v13 = vld [vmem:[%s6450_s2 + $0xb8] sm:$0xff]  }
 0x2c7   : > { %2895 = vmatpush1.bf16.msra.mxu0 %v4634_v13 }
 0x2c8   : > { %3153 = vmatprep.subr.bf16.mxu0 %v5566_v51 }
 0x2cd   : > { %2081 = vmatmul.mubr.bf16.gmra.mrb[52].mxu1 %v5538_v41 }
 0x2ce   : > { %4060 = vmatprep.mubr.msk.bf16.mxu1 %vm255_vm2, %v5541_v15 }
 0x2d5   : > { %2089 = vmatmul.mubr.bf16.gmra.mrb[56].mxu1 %v5545_v7 }
 0x2d6   : > { %4061 = vmatprep.mubr.msk.bf16.mxu1 %vm255_vm2, %v5548_v26 }
 0x2dd   : > { %2097 = vmatmul.mubr.bf16.gmra.mrb[60].mxu1 %v5552_v46 }
 0x2de   : > { %4062 = vmatprep.mubr.msk.bf16.mxu1 %vm255_vm2, %v5555_v40 }
 0x2e5   : > { %2105 = vmatmul.mubr.bf16.gmra.mrb[64].mxu1 %v5559_v36 }
 0x2e6   : > { %4063 = vmatprep.mubr.msk.bf16.mxu1 %vm255_vm2, %v1814_v28 }
 0x2ed   : > { %2113 = vmatmul.mubr.bf16.gmra.mrb[68].mxu1 %v5566_v51 }
 0x348   : > { %v1994_v11 = vpop.f32.mrb[8].mxu1 }
 0x349   : > { %v2153_v1 = vmul.f32 %v5746_v5, %v1994_v11  ;;  %v1996_v34 = vpop.f32.mrb[9].mxu1 }
 0x34a   : > { %v1997_v47 = vpop.f32.mrb[10].mxu1 }
 0x34b   : > { %v2191_v0 = vadd.f32 %v5738_v4, %v2153_v1  ;;  %v2154_v6 = vmul.f32 %v5746_v5, %v1997_v47  ;;  %v1999_v54 = vpop.f32.mrb[11].mxu1 }
 0x34d   : > { %v2223_v52 = vmax.f32 %v2191_v0, 0.0  ;;  %v2192_v50 = vadd.f32 %v5738_v4, %v2154_v6 }
 0x34f   : > { %v2224_v45 = vmax.f32 %v2192_v50, 0.0  ;;  %v2287_v61 = vrot.slane %v2223_v52, 7  ;;  %v2383_v23 = vrot.slane %v2223_v52, 1 }
 0x350   : > { %v2002_v49 = vpop.f32.mrb[12].mxu1 }
 0x351   : > { %v2288_v3 = vrot.slane %v2224_v45, 7  ;;  %v2384_v22 = vrot.slane %v2224_v45, 1  ;;  %v2155_v38 = vmul.f32 %v5746_v5, %v2002_v49  ;;  %v2004_v19 = vpop.f32.mrb[13].mxu1  ;;  %v2512_v56 = vpack.c.bf16 %v2224_v45, %v2223_v52 }
 0x352   : > { %v2005_v35 = vpop.f32.mrb[14].mxu1  ;;  %v2367_v59 = vsel %vm751_vm4, 0.0, %v2287_v61 }
 0x353   : > { %v2385_v21 = vsel %vm848_vm3, %v2383_v23, %v2384_v22  ;;  %v2463_v43 = vsel %vm848_vm3, %v2384_v22, 0.0  ;;  %v2193_v58 = vadd.f32 %v5738_v4, %v2155_v38  ;;  %v2156_v12 = vmul.f32 %v5746_v5, %v2005_v35  ;;  %2544 = vrot.lane.b32.xlu0 %v2512_v56, %s4729_s18  ;;  %v2007_v42 = vpop.f32.mrb[15].mxu1 }
 0x354   : > { %v2608_v2 = vpack.c.bf16 %v2463_v43, %v2385_v21  ;;  %v2289_v44 = vsel %vm751_vm4, %v2287_v61, %v2288_v3 }
 0x355   : > { %v2225_v41 = vmax.f32 %v2193_v58, 0.0  ;;  %v2194_v15 = vadd.f32 %v5738_v4, %v2156_v12  ;;  %v2479_v7 = vpack.c.bf16 %v2289_v44, %v2367_v59 }
 0x356   : > { %2624 = vst.msk [vmem:[#allocation3 + $0x18] sm:$0xff] %vm255_vm2, %v2608_v2 }
 0x357   : > { %v2226_v26 = vmax.f32 %v2194_v15, 0.0  ;;  %2496 = vst.msk [vmem:[#allocation3 + $0x10] sm:$0xff] %vm255_vm2, %v2479_v7  ;;  %v2290_v46 = vrot.slane %v2225_v41, 7  ;;  %v2386_v40 = vrot.slane %v2225_v41, 1 }
 0x358   : > { %v2010_v10 = vpop.f32.mrb[16].mxu1 }
 0x359   : > { %v2291_v36 = vrot.slane %v2226_v26, 7  ;;  %v2387_v48 = vrot.slane %v2226_v26, 1  ;;  %v2157_v57 = vmul.f32 %v5746_v5, %v2010_v10  ;;  %v2012_v37 = vpop.f32.mrb[17].mxu1  ;;  %v2513_v16 = vpack.c.bf16 %v2226_v26, %v2225_v41 }
 0x35a   : > { %v2013_v39 = vpop.f32.mrb[18].mxu1  ;;  %v2368_v53 = vsel %vm751_vm4, 0.0, %v2290_v46 }
 0x35b   : > { %v2388_v24 = vsel %vm848_vm3, %v2386_v40, %v2387_v48  ;;  %v2464_v33 = vsel %vm848_vm3, %v2387_v48, 0.0  ;;  %v2195_v31 = vadd.f32 %v5738_v4, %v2157_v57  ;;  %v2158_v60 = vmul.f32 %v5746_v5, %v2013_v39  ;;  %2546 = vrot.lane.b32.xlu1 %v2513_v16, %s4729_s18  ;;  %v2015_v25 = vpop.f32.mrb[19].mxu1 }
 0x35c   : > { %v2609_v27 = vpack.c.bf16 %v2464_v33, %v2388_v24  ;;  %v2292_v14 = vsel %vm751_vm4, %v2290_v46, %v2291_v36 }
 0x35d   : > { %v2227_v28 = vmax.f32 %v2195_v31, 0.0  ;;  %v2196_v51 = vadd.f32 %v5738_v4, %v2158_v60  ;;  %v2697_v8 = vld [vmem:[#allocation3 + $0x18] sm:$0xff]  ;;  %v2480_v17 = vpack.c.bf16 %v2292_v14, %v2368_v53 }
 0x35e   : > { %2625 = vst.msk [vmem:[#allocation3 + $0x28] sm:$0xff] %vm255_vm2, %v2609_v27  ;;  %4101 = vmatprep.mubr.msk.bf16.mxu0 %vm255_vm2, %v2697_v8 }
 0x35f   : > { %v2228_v29 = vmax.f32 %v2196_v51, 0.0  ;;  %2497 = vst.msk [vmem:[#allocation3 + $0x20] sm:$0xff] %vm255_vm2, %v2480_v17  ;;  %v2293_v9 = vrot.slane %v2227_v28, 7  ;;  %v2389_v20 = vrot.slane %v2227_v28, 1 }
 0x360   : > { %v2018_v18 = vpop.f32.mrb[20].mxu1 }
 0x361   : > { %v2294_v32 = vrot.slane %v2228_v29, 7  ;;  %v2390_v55 = vrot.slane %v2228_v29, 1  ;;  %v2159_v11 = vmul.f32 %v5746_v5, %v2018_v18  ;;  %v2020_v62 = vpop.f32.mrb[21].mxu1  ;;  %v2514_v1 = vpack.c.bf16 %v2228_v29, %v2227_v28 }
 0x362   : > { %v2021_v34 = vpop.f32.mrb[22].mxu1  ;;  %v2369_v63 = vsel %vm751_vm4, 0.0, %v2293_v9 }
 0x363   : > { %v2391_v47 = vsel %vm848_vm3, %v2389_v20, %v2390_v55  ;;  %v2465_v0 = vsel %vm848_vm3, %v2390_v55, 0.0  ;;  %v2197_v6 = vadd.f32 %v5738_v4, %v2159_v11  ;;  %v2160_v54 = vmul.f32 %v5746_v5, %v2021_v34  ;;  %2548 = vrot.lane.b32.xlu0 %v2514_v1, %s4729_s18  ;;  %v2023_v52 = vpop.f32.mrb[23].mxu1 }
 0x364   : > { %v2610_v50 = vpack.c.bf16 %v2465_v0, %v2391_v47  ;;  %v2295_v45 = vsel %vm751_vm4, %v2293_v9, %v2294_v32 }
 0x365   : > { %v2229_v61 = vmax.f32 %v2197_v6, 0.0  ;;  %v2198_v23 = vadd.f32 %v5738_v4, %v2160_v54  ;;  %v2481_v49 = vpack.c.bf16 %v2295_v45, %v2369_v63 }
 0x366   : > { %2626 = vst.msk [vmem:[#allocation3 + $0x38] sm:$0xff] %vm255_vm2, %v2610_v50 }
 0x367   : > { %v2230_v30 = vmax.f32 %v2198_v23, 0.0  ;;  %2498 = vst.msk [vmem:[#allocation3 + $0x30] sm:$0xff] %vm255_vm2, %v2481_v49  ;;  %v2296_v3 = vrot.slane %v2229_v61, 7  ;;  %v2392_v22 = vrot.slane %v2229_v61, 1 }
 0x368   : > { %v2026_v38 = vpop.f32.mrb[24].mxu1 }
 0x369   : > { %v2297_v19 = vrot.slane %v2230_v30, 7  ;;  %v2393_v56 = vrot.slane %v2230_v30, 1  ;;  %v2161_v35 = vmul.f32 %v5746_v5, %v2026_v38  ;;  %v2028_v21 = vpop.f32.mrb[25].mxu1  ;;  %v2515_v43 = vpack.c.bf16 %v2230_v30, %v2229_v61 }
 0x36a   : > { %v2029_v58 = vpop.f32.mrb[26].mxu1  ;;  %v2370_v41 = vsel %vm751_vm4, 0.0, %v2296_v3 }
 0x36b   : > { %v2394_v12 = vsel %vm848_vm3, %v2392_v22, %v2393_v56  ;;  %v2466_v42 = vsel %vm848_vm3, %v2393_v56, 0.0  ;;  %v2199_v2 = vadd.f32 %v5738_v4, %v2161_v35  ;;  %v2162_v59 = vmul.f32 %v5746_v5, %v2029_v58  ;;  %2550 = vrot.lane.b32.xlu1 %v2515_v43, %s4729_s18  ;;  %v2031_v44 = vpop.f32.mrb[27].mxu1 }
 0x36c   : > { %v2611_v13 = vpack.c.bf16 %v2466_v42, %v2394_v12  ;;  %v2298_v15 = vsel %vm751_vm4, %v2296_v3, %v2297_v19 }
 0x36d   : > { %v2231_v7 = vmax.f32 %v2199_v2, 0.0  ;;  %v2200_v26 = vadd.f32 %v5738_v4, %v2162_v59  ;;  %v2482_v46 = vpack.c.bf16 %v2298_v15, %v2370_v41 }
 0x36e   : > { %2627 = vst.msk [vmem:[#allocation3 + $0x48] sm:$0xff] %vm255_vm2, %v2611_v13 }
 0x36f   : > { %v2232_v40 = vmax.f32 %v2200_v26, 0.0  ;;  %2499 = vst.msk [vmem:[#allocation3 + $0x40] sm:$0xff] %vm255_vm2, %v2482_v46  ;;  %v2299_v10 = vrot.slane %v2231_v7, 7  ;;  %v2395_v36 = vrot.slane %v2231_v7, 1 }
 0x370   : > { %v2034_v48 = vpop.f32.mrb[28].mxu1 }
 0x371   : > { %v2300_v57 = vrot.slane %v2232_v40, 7  ;;  %v2396_v37 = vrot.slane %v2232_v40, 1  ;;  %v2163_v16 = vmul.f32 %v5746_v5, %v2034_v48  ;;  %v2036_v39 = vpop.f32.mrb[29].mxu1  ;;  %v2516_v24 = vpack.c.bf16 %v2232_v40, %v2231_v7 }
 0x372   : > { %v2037_v33 = vpop.f32.mrb[30].mxu1  ;;  %v2371_v28 = vsel %vm751_vm4, 0.0, %v2299_v10 }
 0x373   : > { %v2397_v31 = vsel %vm848_vm3, %v2395_v36, %v2396_v37  ;;  %v2467_v60 = vsel %vm848_vm3, %v2396_v37, 0.0  ;;  %v2201_v25 = vadd.f32 %v5738_v4, %v2163_v16  ;;  %v2164_v27 = vmul.f32 %v5746_v5, %v2037_v33  ;;  %2552 = vrot.lane.b32.xlu0 %v2516_v24, %s4729_s18  ;;  %v2039_v53 = vpop.f32.mrb[31].mxu1 }
 0x374   : > { %v2612_v14 = vpack.c.bf16 %v2467_v60, %v2397_v31  ;;  %v2301_v51 = vsel %vm751_vm4, %v2299_v10, %v2300_v57 }
 0x375   : > { %v2233_v8 = vmax.f32 %v2201_v25, 0.0  ;;  %v2202_v17 = vadd.f32 %v5738_v4, %v2164_v27  ;;  %v2483_v29 = vpack.c.bf16 %v2301_v51, %v2371_v28 }
 0x376   : > { %2628 = vst.msk [vmem:[#allocation3 + $0x58] sm:$0xff] %vm255_vm2, %v2612_v14 }
 0x377   : > { %v2234_v9 = vmax.f32 %v2202_v17, 0.0  ;;  %2500 = vst.msk [vmem:[#allocation3 + $0x50] sm:$0xff] %vm255_vm2, %v2483_v29  ;;  %v2302_v20 = vrot.slane %v2233_v8, 7  ;;  %v2398_v18 = vrot.slane %v2233_v8, 1 }
 0x378   : > { %v2042_v32 = vpop.f32.mrb[32].mxu1 }
 0x379   : > { %v2303_v55 = vrot.slane %v2234_v9, 7  ;;  %v2399_v11 = vrot.slane %v2234_v9, 1  ;;  %v2165_v62 = vmul.f32 %v5746_v5, %v2042_v32  ;;  %v2044_v1 = vpop.f32.mrb[33].mxu1  ;;  %v2517_v34 = vpack.c.bf16 %v2234_v9, %v2233_v8 }
 0x37a   : > { %v2045_v47 = vpop.f32.mrb[34].mxu1  ;;  %v2372_v45 = vsel %vm751_vm4, 0.0, %v2302_v20 }
 0x37b   : > { %v2400_v0 = vsel %vm848_vm3, %v2398_v18, %v2399_v11  ;;  %v2468_v6 = vsel %vm848_vm3, %v2399_v11, 0.0  ;;  %v2203_v54 = vadd.f32 %v5738_v4, %v2165_v62  ;;  %v2166_v52 = vmul.f32 %v5746_v5, %v2045_v47  ;;  %2554 = vrot.lane.b32.xlu1 %v2517_v34, %s4729_s18  ;;  %v2047_v50 = vpop.f32.mrb[35].mxu1 }
 0x37c   : > { %v2613_v63 = vpack.c.bf16 %v2468_v6, %v2400_v0  ;;  %v2304_v61 = vsel %vm751_vm4, %v2302_v20, %v2303_v55 }
 0x37d   : > { %v2235_v23 = vmax.f32 %v2203_v54, 0.0  ;;  %v2204_v49 = vadd.f32 %v5738_v4, %v2166_v52  ;;  %v2484_v30 = vpack.c.bf16 %v2304_v61, %v2372_v45 }
 0x37e   : > { %2629 = vst.msk [vmem:[#allocation3 + $0x68] sm:$0xff] %vm255_vm2, %v2613_v63 }
 0x37f   : > { %v2236_v3 = vmax.f32 %v2204_v49, 0.0  ;;  %2501 = vst.msk [vmem:[#allocation3 + $0x60] sm:$0xff] %vm255_vm2, %v2484_v30  ;;  %v2305_v22 = vrot.slane %v2235_v23, 7  ;;  %v2401_v38 = vrot.slane %v2235_v23, 1 }
 0x380   : > { %v2050_v19 = vpop.f32.mrb[36].mxu1 }
 0x381   : > { %v2306_v56 = vrot.slane %v2236_v3, 7  ;;  %v2402_v35 = vrot.slane %v2236_v3, 1  ;;  %v2167_v21 = vmul.f32 %v5746_v5, %v2050_v19  ;;  %v2052_v43 = vpop.f32.mrb[37].mxu1  ;;  %v2518_v58 = vpack.c.bf16 %v2236_v3, %v2235_v23 }
 0x382   : > { %v2053_v12 = vpop.f32.mrb[38].mxu1  ;;  %v2373_v15 = vsel %vm751_vm4, 0.0, %v2305_v22 }
 0x383   : > { %v2403_v42 = vsel %vm848_vm3, %v2401_v38, %v2402_v35  ;;  %v2469_v2 = vsel %vm848_vm3, %v2402_v35, 0.0  ;;  %v2205_v59 = vadd.f32 %v5738_v4, %v2167_v21  ;;  %v2168_v44 = vmul.f32 %v5746_v5, %v2053_v12  ;;  %2556 = vrot.lane.b32.xlu0 %v2518_v58, %s4729_s18  ;;  %v2055_v13 = vpop.f32.mrb[39].mxu1 }
 0x384   : > { %v2614_v41 = vpack.c.bf16 %v2469_v2, %v2403_v42  ;;  %v2307_v7 = vsel %vm751_vm4, %v2305_v22, %v2306_v56 }
 0x385   : > { %v2237_v26 = vmax.f32 %v2205_v59, 0.0  ;;  %v2206_v46 = vadd.f32 %v5738_v4, %v2168_v44  ;;  %v2485_v40 = vpack.c.bf16 %v2307_v7, %v2373_v15 }
 0x386   : > { %2630 = vst.msk [vmem:[#allocation3 + $0x78] sm:$0xff] %vm255_vm2, %v2614_v41 }
 0x387   : > { %v2238_v10 = vmax.f32 %v2206_v46, 0.0  ;;  %2502 = vst.msk [vmem:[#allocation3 + $0x70] sm:$0xff] %vm255_vm2, %v2485_v40  ;;  %v2308_v36 = vrot.slane %v2237_v26, 7  ;;  %v2404_v48 = vrot.slane %v2237_v26, 1 }
 0x388   : > { %v2058_v57 = vpop.f32.mrb[40].mxu1 }
 0x389   : > { %v2309_v37 = vrot.slane %v2238_v10, 7  ;;  %v2405_v16 = vrot.slane %v2238_v10, 1  ;;  %v2169_v39 = vmul.f32 %v5746_v5, %v2058_v57  ;;  %v2060_v24 = vpop.f32.mrb[41].mxu1  ;;  %v2519_v33 = vpack.c.bf16 %v2238_v10, %v2237_v26 }
 0x38a   : > { %v2061_v31 = vpop.f32.mrb[42].mxu1  ;;  %v2374_v51 = vsel %vm751_vm4, 0.0, %v2308_v36 }
 0x38b   : > { %v2406_v60 = vsel %vm848_vm3, %v2404_v48, %v2405_v16  ;;  %v2470_v25 = vsel %vm848_vm3, %v2405_v16, 0.0  ;;  %v2207_v27 = vadd.f32 %v5738_v4, %v2169_v39  ;;  %v2170_v53 = vmul.f32 %v5746_v5, %v2061_v31  ;;  %2558 = vrot.lane.b32.xlu1 %v2519_v33, %s4729_s18  ;;  %v2063_v14 = vpop.f32.mrb[43].mxu1 }
 0x38c   : > { %v2615_v28 = vpack.c.bf16 %v2470_v25, %v2406_v60  ;;  %v2310_v8 = vsel %vm751_vm4, %v2308_v36, %v2309_v37 }
 0x38d   : > { %v2239_v17 = vmax.f32 %v2207_v27, 0.0  ;;  %v2208_v29 = vadd.f32 %v5738_v4, %v2170_v53  ;;  %v2486_v9 = vpack.c.bf16 %v2310_v8, %v2374_v51 }
 0x38e   : > { %2631 = vst.msk [vmem:[#allocation3 + $0x88] sm:$0xff] %vm255_vm2, %v2615_v28 }
 0x38f   : > { %v2240_v20 = vmax.f32 %v2208_v29, 0.0  ;;  %2503 = vst.msk [vmem:[#allocation3 + $0x80] sm:$0xff] %vm255_vm2, %v2486_v9  ;;  %v2311_v18 = vrot.slane %v2239_v17, 7  ;;  %v2407_v32 = vrot.slane %v2239_v17, 1 }
 0x390   : > { %v2066_v55 = vpop.f32.mrb[44].mxu1 }
 0x391   : > { %v2312_v11 = vrot.slane %v2240_v20, 7  ;;  %v2408_v62 = vrot.slane %v2240_v20, 1  ;;  %v2171_v1 = vmul.f32 %v5746_v5, %v2066_v55  ;;  %v2068_v34 = vpop.f32.mrb[45].mxu1  ;;  %v2520_v47 = vpack.c.bf16 %v2240_v20, %v2239_v17 }
 0x392   : > { %v2069_v0 = vpop.f32.mrb[46].mxu1  ;;  %v2375_v61 = vsel %vm751_vm4, 0.0, %v2311_v18 }
 0x393   : > { %v2409_v6 = vsel %vm848_vm3, %v2407_v32, %v2408_v62  ;;  %v2471_v54 = vsel %vm848_vm3, %v2408_v62, 0.0  ;;  %v2209_v52 = vadd.f32 %v5738_v4, %v2171_v1  ;;  %v2172_v50 = vmul.f32 %v5746_v5, %v2069_v0  ;;  %2560 = vrot.lane.b32.xlu0 %v2520_v47, %s4729_s18  ;;  %v2071_v63 = vpop.f32.mrb[47].mxu1 }
 0x394   : > { %v2616_v45 = vpack.c.bf16 %v2471_v54, %v2409_v6  ;;  %v2313_v23 = vsel %vm751_vm4, %v2311_v18, %v2312_v11 }
 0x395   : > { %v2241_v49 = vmax.f32 %v2209_v52, 0.0  ;;  %v2210_v30 = vadd.f32 %v5738_v4, %v2172_v50  ;;  %v2487_v3 = vpack.c.bf16 %v2313_v23, %v2375_v61 }
 0x396   : > { %2632 = vst.msk [vmem:[#allocation3 + $0x98] sm:$0xff] %vm255_vm2, %v2616_v45 }
 0x397   : > { %v2242_v22 = vmax.f32 %v2210_v30, 0.0  ;;  %2504 = vst.msk [vmem:[#allocation3 + $0x90] sm:$0xff] %vm255_vm2, %v2487_v3  ;;  %v2314_v38 = vrot.slane %v2241_v49, 7  ;;  %v2410_v19 = vrot.slane %v2241_v49, 1 }
 0x398   : > { %v2074_v56 = vpop.f32.mrb[48].mxu1 }
 0x399   : > { %v2315_v35 = vrot.slane %v2242_v22, 7  ;;  %v2411_v21 = vrot.slane %v2242_v22, 1  ;;  %v2173_v43 = vmul.f32 %v5746_v5, %v2074_v56  ;;  %v2076_v58 = vpop.f32.mrb[49].mxu1  ;;  %v2521_v12 = vpack.c.bf16 %v2242_v22, %v2241_v49 }
 0x39a   : > { %v2077_v42 = vpop.f32.mrb[50].mxu1  ;;  %v2376_v7 = vsel %vm751_vm4, 0.0, %v2314_v38 }
 0x39b   : > { %v2412_v2 = vsel %vm848_vm3, %v2410_v19, %v2411_v21  ;;  %v2472_v59 = vsel %vm848_vm3, %v2411_v21, 0.0  ;;  %v2211_v44 = vadd.f32 %v5738_v4, %v2173_v43  ;;  %v2174_v13 = vmul.f32 %v5746_v5, %v2077_v42  ;;  %2562 = vrot.lane.b32.xlu1 %v2521_v12, %s4729_s18  ;;  %v2079_v41 = vpop.f32.mrb[51].mxu1 }
 0x39c   : > { %v2617_v15 = vpack.c.bf16 %v2472_v59, %v2412_v2  ;;  %v2316_v26 = vsel %vm751_vm4, %v2314_v38, %v2315_v35 }
 0x39d   : > { %v2243_v46 = vmax.f32 %v2211_v44, 0.0  ;;  %v2212_v40 = vadd.f32 %v5738_v4, %v2174_v13  ;;  %v2488_v10 = vpack.c.bf16 %v2316_v26, %v2376_v7 }
 0x39e   : > { %2633 = vst.msk [vmem:[#allocation3 + $0xa8] sm:$0xff] %vm255_vm2, %v2617_v15 }
 0x39f   : > { %v2244_v36 = vmax.f32 %v2212_v40, 0.0  ;;  %2505 = vst.msk [vmem:[#allocation3 + $0xa0] sm:$0xff] %vm255_vm2, %v2488_v10  ;;  %v2317_v48 = vrot.slane %v2243_v46, 7  ;;  %v2413_v57 = vrot.slane %v2243_v46, 1 }
 0x3a0   : > { %v2082_v37 = vpop.f32.mrb[52].mxu1 }
 0x3a1   : > { %v2318_v16 = vrot.slane %v2244_v36, 7  ;;  %v2414_v39 = vrot.slane %v2244_v36, 1  ;;  %v2175_v24 = vmul.f32 %v5746_v5, %v2082_v37  ;;  %v2084_v33 = vpop.f32.mrb[53].mxu1  ;;  %v2522_v31 = vpack.c.bf16 %v2244_v36, %v2243_v46 }
 0x3a2   : > { %v2085_v60 = vpop.f32.mrb[54].mxu1  ;;  %v2377_v8 = vsel %vm751_vm4, 0.0, %v2317_v48 }
 0x3a3   : > { %v2415_v25 = vsel %vm848_vm3, %v2413_v57, %v2414_v39  ;;  %v2473_v27 = vsel %vm848_vm3, %v2414_v39, 0.0  ;;  %v2213_v53 = vadd.f32 %v5738_v4, %v2175_v24  ;;  %v2176_v14 = vmul.f32 %v5746_v5, %v2085_v60  ;;  %2564 = vrot.lane.b32.xlu0 %v2522_v31, %s4729_s18  ;;  %v2087_v28 = vpop.f32.mrb[55].mxu1 }
 0x3a4   : > { %v2618_v51 = vpack.c.bf16 %v2473_v27, %v2415_v25  ;;  %v2319_v17 = vsel %vm751_vm4, %v2317_v48, %v2318_v16 }
 0x3a5   : > { %v2245_v29 = vmax.f32 %v2213_v53, 0.0  ;;  %v2214_v9 = vadd.f32 %v5738_v4, %v2176_v14  ;;  %v2489_v20 = vpack.c.bf16 %v2319_v17, %v2377_v8 }
 0x3a6   : > { %2634 = vst.msk [vmem:[#allocation3 + $0xb8] sm:$0xff] %vm255_vm2, %v2618_v51 }
 0x3a7   : > { %v2246_v18 = vmax.f32 %v2214_v9, 0.0  ;;  %2506 = vst.msk [vmem:[#allocation3 + $0xb0] sm:$0xff] %vm255_vm2, %v2489_v20  ;;  %v2320_v32 = vrot.slane %v2245_v29, 7  ;;  %v2416_v55 = vrot.slane %v2245_v29, 1 }
 0x3a8   : > { %v2090_v11 = vpop.f32.mrb[56].mxu1 }
 0x3a9   : > { %v2321_v62 = vrot.slane %v2246_v18, 7  ;;  %v2417_v1 = vrot.slane %v2246_v18, 1  ;;  %v2177_v34 = vmul.f32 %v5746_v5, %v2090_v11  ;;  %v2092_v47 = vpop.f32.mrb[57].mxu1  ;;  %v2523_v0 = vpack.c.bf16 %v2246_v18, %v2245_v29 }
 0x3aa   : > { %v2093_v6 = vpop.f32.mrb[58].mxu1  ;;  %v2378_v23 = vsel %vm751_vm4, 0.0, %v2320_v32 }
 0x3ab   : > { %v2418_v54 = vsel %vm848_vm3, %v2416_v55, %v2417_v1  ;;  %v2474_v52 = vsel %vm848_vm3, %v2417_v1, 0.0  ;;  %v2215_v50 = vadd.f32 %v5738_v4, %v2177_v34  ;;  %v2178_v63 = vmul.f32 %v5746_v5, %v2093_v6  ;;  %2566 = vrot.lane.b32.xlu1 %v2523_v0, %s4729_s18  ;;  %v2095_v45 = vpop.f32.mrb[59].mxu1 }
 0x3ac   : > { %v2619_v61 = vpack.c.bf16 %v2474_v52, %v2418_v54  ;;  %v2322_v49 = vsel %vm751_vm4, %v2320_v32, %v2321_v62 }
 0x3ad   : > { %v2247_v30 = vmax.f32 %v2215_v50, 0.0  ;;  %v2216_v3 = vadd.f32 %v5738_v4, %v2178_v63  ;;  %v2490_v22 = vpack.c.bf16 %v2322_v49, %v2378_v23 }
 0x3ae   : > { %2635 = vst.msk [vmem:[#allocation3 + $0xc8] sm:$0xff] %vm255_vm2, %v2619_v61 }
 0x3af   : > { %v2248_v38 = vmax.f32 %v2216_v3, 0.0  ;;  %2507 = vst.msk [vmem:[#allocation3 + $0xc0] sm:$0xff] %vm255_vm2, %v2490_v22  ;;  %v2323_v19 = vrot.slane %v2247_v30, 7  ;;  %v2419_v56 = vrot.slane %v2247_v30, 1 }
 0x3b0   : > { %v2098_v35 = vpop.f32.mrb[60].mxu1 }
 0x3b1   : > { %v2324_v21 = vrot.slane %v2248_v38, 7  ;;  %v2420_v43 = vrot.slane %v2248_v38, 1  ;;  %v2179_v58 = vmul.f32 %v5746_v5, %v2098_v35  ;;  %v2100_v12 = vpop.f32.mrb[61].mxu1  ;;  %v2524_v42 = vpack.c.bf16 %v2248_v38, %v2247_v30 }
 0x3b2   : > { %v2101_v2 = vpop.f32.mrb[62].mxu1  ;;  %v2379_v26 = vsel %vm751_vm4, 0.0, %v2323_v19 }
 0x3b3   : > { %v2421_v59 = vsel %vm848_vm3, %v2419_v56, %v2420_v43  ;;  %v2475_v44 = vsel %vm848_vm3, %v2420_v43, 0.0  ;;  %v2217_v13 = vadd.f32 %v5738_v4, %v2179_v58  ;;  %v2180_v41 = vmul.f32 %v5746_v5, %v2101_v2  ;;  %2568 = vrot.lane.b32.xlu0 %v2524_v42, %s4729_s18  ;;  %v2103_v15 = vpop.f32.mrb[63].mxu1 }
 0x3b4   : > { %v2620_v7 = vpack.c.bf16 %v2475_v44, %v2421_v59  ;;  %v2325_v46 = vsel %vm751_vm4, %v2323_v19, %v2324_v21 }
 0x3b5   : > { %v2249_v40 = vmax.f32 %v2217_v13, 0.0  ;;  %v2218_v10 = vadd.f32 %v5738_v4, %v2180_v41  ;;  %v2491_v36 = vpack.c.bf16 %v2325_v46, %v2379_v26  ;;  %v4636_v26 = vld [vmem:[%s6450_s2 + $0x8] sm:$0xff]   ;;  %v5954_v46 = vld [vmem:[#allocation2] sm:$0xff] }
 0x3b6   : > { %2636 = vst.msk [vmem:[#allocation3 + $0xd8] sm:$0xff] %vm255_vm2, %v2620_v7  ;;  %v5946_v7 = vld [vmem:[#allocation3 + $0x28] sm:$0xff] }
 0x3b7   : > { %v2250_v48 = vmax.f32 %v2218_v10, 0.0  ;;  %2508 = vst.msk [vmem:[#allocation3 + $0xd0] sm:$0xff] %vm255_vm2, %v2491_v36  ;;  %v2326_v57 = vrot.slane %v2249_v40, 7  ;;  %v2422_v37 = vrot.slane %v2249_v40, 1 }
 0x3b8   : > { %v2106_v16 = vpop.f32.mrb[64].mxu1 }
 0x3b9   : > { %v2327_v39 = vrot.slane %v2250_v48, 7  ;;  %v2423_v24 = vrot.slane %v2250_v48, 1  ;;  %v2181_v33 = vmul.f32 %v5746_v5, %v2106_v16  ;;  %v2108_v31 = vpop.f32.mrb[65].mxu1  ;;  %v2525_v60 = vpack.c.bf16 %v2250_v48, %v2249_v40  ;;  %v4637_v40 = vld [vmem:[%s6450_s2 + $0x10] sm:$0xff]   ;;  %v5965_v48 = vld [vmem:[#allocation3 + $0x38] sm:$0xff] }
 0x3ba   : > { %v2109_v25 = vpop.f32.mrb[66].mxu1  ;;  %v2380_v17 = vsel %vm751_vm4, 0.0, %v2326_v57  ;;  %v4641_v31 = vld [vmem:[%s6450_s2 + $0x30] sm:$0xff]  }
 0x3bb   : > { %v2424_v27 = vsel %vm848_vm3, %v2422_v37, %v2423_v24  ;;  %v2476_v53 = vsel %vm848_vm3, %v2423_v24, 0.0  ;;  %v2219_v14 = vadd.f32 %v5738_v4, %v2181_v33  ;;  %v2182_v28 = vmul.f32 %v5746_v5, %v2109_v25  ;;  %2570 = vrot.lane.b32.xlu1 %v2525_v60, %s4729_s18  ;;  %v2111_v51 = vpop.f32.mrb[67].mxu1  ;;  %v4639_v37 = vld [vmem:[%s6450_s2 + $0x20] sm:$0xff]   ;;  %v5981_v24 = vld [vmem:[#allocation3 + $0x48] sm:$0xff] }
 0x3bc   : > { %v2621_v8 = vpack.c.bf16 %v2476_v53, %v2424_v27  ;;  %v2328_v29 = vsel %vm751_vm4, %v2326_v57, %v2327_v39  ;;  %v4638_v57 = vld [vmem:[%s6450_s2 + $0x18] sm:$0xff]   ;;  %v4640_v33 = vld [vmem:[%s6450_s2 + $0x28] sm:$0xff]  }
 0x3bd   : > { %v2251_v9 = vmax.f32 %v2219_v14, 0.0  ;;  %v2220_v20 = vadd.f32 %v5738_v4, %v2182_v28  ;;  %v2492_v18 = vpack.c.bf16 %v2328_v29, %v2380_v17  ;;  %v5997_v27 = vld [vmem:[#allocation3 + $0x58] sm:$0xff]  ;;  %v4643_v14 = vld [vmem:[%s6450_s2 + $0x40] sm:$0xff]   ;;  %v4644_v17 = vld [vmem:[%s6450_s2 + $0x48] sm:$0xff]  }
 0x3be   : > { %2637 = vst.msk [vmem:[#allocation3 + $0xe8] sm:$0xff] %vm255_vm2, %v2621_v8  ;;  %v4642_v53 = vld [vmem:[%s6450_s2 + $0x38] sm:$0xff]   ;;  %v6013_v8 = vld [vmem:[#allocation3 + $0x68] sm:$0xff]  ;;  %v4645_v29 = vld [vmem:[%s6450_s2 + $0x50] sm:$0xff]  }
 0x3bf   : > { %v2252_v32 = vmax.f32 %v2220_v20, 0.0  ;;  %2509 = vst.msk [vmem:[#allocation3 + $0xe0] sm:$0xff] %vm255_vm2, %v2492_v18  ;;  %v2329_v55 = vrot.slane %v2251_v9, 7  ;;  %v2425_v11 = vrot.slane %v2251_v9, 1  ;;  %v6029_v18 = vld [vmem:[#allocation3 + $0x78] sm:$0xff] }
 0x3c0   : > { %v2114_v62 = vpop.f32.mrb[68].mxu1 }
 0x3c1   : > { %v2330_v1 = vrot.slane %v2252_v32, 7  ;;  %v2426_v34 = vrot.slane %v2252_v32, 1  ;;  %v2183_v47 = vmul.f32 %v5746_v5, %v2114_v62  ;;  %v2116_v0 = vpop.f32.mrb[69].mxu1  ;;  %v2526_v6 = vpack.c.bf16 %v2252_v32, %v2251_v9  ;;  %v4646_v32 = vld [vmem:[%s6450_s2 + $0x58] sm:$0xff]   ;;  %v6042_v62 = vld [vmem:[#allocation3 + $0x88] sm:$0xff] }
 0x3c2   : > { %v2117_v54 = vpop.f32.mrb[70].mxu1  ;;  %v2381_v49 = vsel %vm751_vm4, 0.0, %v2329_v55 }
 0x3c3   : > { %v2427_v52 = vsel %vm848_vm3, %v2425_v11, %v2426_v34  ;;  %v2477_v50 = vsel %vm848_vm3, %v2426_v34, 0.0  ;;  %v2221_v63 = vadd.f32 %v5738_v4, %v2183_v47  ;;  %v2184_v45 = vmul.f32 %v5746_v5, %v2117_v54  ;;  %2572 = vrot.lane.b32.xlu0 %v2526_v6, %s4729_s18  ;;  %v2119_v61 = vpop.f32.mrb[71].mxu1  ;;  %v6050_v47 = vld [vmem:[#allocation3 + $0x98] sm:$0xff]  ;;  %v6058_v54 = vld [vmem:[#allocation3 + $0xa8] sm:$0xff] }
 0x3c4   : > { %v2622_v23 = vpack.c.bf16 %v2477_v50, %v2427_v52  ;;  %v2331_v30 = vsel %vm751_vm4, %v2329_v55, %v2330_v1 }
 0x3c5   : > { %v2253_v3 = vmax.f32 %v2221_v63, 0.0  ;;  %v2222_v22 = vadd.f32 %v5738_v4, %v2184_v45  ;;  %v2545_v38 = vpop.permute.xlu0 %2544  ;;  %v2493_v19 = vpack.c.bf16 %v2331_v30, %v2381_v49  ;;  %v4635_v4 = vld [vmem:[%s6450_s2] sm:$0xff]   ;;  %v6066_v63 = vld [vmem:[#allocation3 + $0xb8] sm:$0xff] }
 0x3c6   : > { %2638 = vst.msk [vmem:[#allocation3 + $0xf8] sm:$0xff] %vm255_vm2, %v2622_v23  ;;  %v6074_v23 = vld [vmem:[#allocation3 + $0xc8] sm:$0xff] }
 0x3c7   : > { %2592 = vst.msk [vmem:[#allocation3 + $0x10] sm:$0xff] %vm1058_vm5, %v2545_v38  ;;  %v2332_v56 = vrot.slane %v2253_v3, 7  ;;  %v2254_v35 = vmax.f32 %v2222_v22, 0.0  ;;  %v2428_v5 = vrot.slane %v2253_v3, 1 }
 0x3c8   : > { %2510 = vst.msk [vmem:[#allocation3 + $0xf0] sm:$0xff] %vm255_vm2, %v2493_v19  ;;  %v6090_v19 = vld [vmem:[#allocation3 + $0xe8] sm:$0xff] }
 0x3c9   : > { %v2333_v21 = vrot.slane %v2254_v35, 7  ;;  %v2429_v43 = vrot.slane %v2254_v35, 1  ;;  %v2527_v58 = vpack.c.bf16 %v2254_v35, %v2253_v3  ;;  %v2382_v2 = vsel %vm751_vm4, 0.0, %v2332_v56  ;;  %v6082_v3 = vld [vmem:[#allocation3 + $0xd8] sm:$0xff] }
 0x3cb   : > { %v2430_v12 = vsel %vm848_vm3, %v2428_v5, %v2429_v43  ;;  %v2478_v42 = vsel %vm848_vm3, %v2429_v43, 0.0  ;;  %2574 = vrot.lane.b32.xlu1 %v2527_v58, %s4729_s18  ;;  %v2334_v59 = vsel %vm751_vm4, %v2332_v56, %v2333_v21  ;;  %s4668_s18 = sshll.u32 %s4730_s11, 4  ;;  %s4669_s18 = int_to_ptr.vmem [resolvable:$false] %s4668_s18 }
 0x3cc   : > { %v2623_v44 = vpack.c.bf16 %v2478_v42, %v2430_v12  ;;  %v2494_v13 = vpack.c.bf16 %v2334_v59, %v2382_v2  ;;  %v2641_v12 = vld [vmem:[#allocation3 + $0x8] sm:$0xff]  ;;  %v2643_v2 = vld [vmem:[#allocation3 + $0x18] sm:$0xff]  ;;  %s4670_s13 = scalar_lea.vmem %s4669_s18, 8192  ;;  %p4671_p0 = scmp.lt.s32.totalorder %s6399_s26, %s4669_s18 }
 0x3cd   : > { %v2547_v41 = vpop.permute.xlu1 %2546  ;;  %v6098_v5 = vld [vmem:[#allocation3 + $0xf8] sm:$0xff]  ;;  %v4648_v59 = vld [vmem:[%s6450_s2 + $0xc8] sm:$0xff]   ;;  %p4672_p1 = scmp.lt.s32.totalorder %s4670_s13, %s4664_s10 }
 0x3ce   : > { %v5941_v15 = vld [vmem:[#allocation3 + $0x10] sm:$0xff]  ;;  %2639 = vst.msk [vmem:[#allocation3 + $0x108] sm:$0xff] %vm255_vm2, %v2623_v44  ;;  %2511 = vst.msk [vmem:[#allocation3 + $0x100] sm:$0xff] %vm255_vm2, %v2494_v13  ;;  %v4650_v13 = vld [vmem:[%s6450_s2 + $0xd8] sm:$0xff]  }
 0x3cf   : > { %2593 = vst.msk [vmem:[#allocation3 + $0x20] sm:$0xff] %vm1058_vm5, %v2547_v41  ;;  %2905 = vmatmul.mubr.bf16.vlgmr.msra.gmra.mrb[24].mxu0 %v5941_v15  ;;  %v4649_v44 = vld [vmem:[%s6450_s2 + $0xd0] sm:$0xff]   ;;  %v4651_v41 = vld [vmem:[%s6450_s2 + $0xe0] sm:$0xff]   ;;  %p4673_p2 = por %p4672_p1, %p4671_p0 }
 0x3d0   : > { %3154 = vmatpush1.bf16.msra.mxu0 %v4635_v4  ;;  %4102 = vmatprep.mubr.msk.bf16.mxu0 %vm255_vm2, %v5946_v7  ;;  %v4647_v4 = vld [vmem:[%s6450_s2 + $0xc0] sm:$0xff]  }
 0x3d1   : > { %3155 = vmatprep.subr.bf16.mxu0 %v5954_v46  ;;  %p4674_p3 = pnand %p4673_p2, %p4667_p13 }
 0x3d4   : > { %3156 = vmatpush1.bf16.msra.mxu0 %v4636_v26  ;;  %v4653_v26 = vld [vmem:[%s6450_s2 + $0xf0] sm:$0xff]  }
 0x3d5   : > { %3157 = vmatprep.subr.bf16.mxu0 %v5954_v46  ;;  %v2549_v10 = vpop.permute.xlu0 %2548  ;;  %v6106_v58 = vld [vmem:[#allocation3 + $0x108] sm:$0xff] }
 0x3d6   : > { %v5961_v36 = vld [vmem:[#allocation3 + $0x20] sm:$0xff]  ;;  %2594 = vst.msk [vmem:[#allocation3 + $0x30] sm:$0xff] %vm1058_vm5, %v2549_v10 }
 0x3d7   : > { %2913 = vmatmul.mubr.bf16.gmra.mrb[28].mxu0 %v5961_v36  ;;  %v4655_v10 = vld [vmem:[%s6450_s2 + $0x100] sm:$0xff]  }
 0x3d8   : > { %4103 = vmatprep.mubr.msk.bf16.mxu0 %vm255_vm2, %v5965_v48  ;;  %3158 = vmatpush1.bf16.msra.mxu0 %v4637_v40  ;;  %v4654_v40 = vld [vmem:[%s6450_s2 + $0xf8] sm:$0xff]  }
 0x3d9   : > { %3159 = vmatprep.subr.bf16.mxu0 %v5954_v46 }
 0x3dc   : > { %3160 = vmatpush1.bf16.msra.mxu0 %v4638_v57  ;;  %v4656_v57 = vld [vmem:[%s6450_s2 + $0x108] sm:$0xff]  }
 0x3dd   : > { %3161 = vmatprep.subr.bf16.mxu0 %v5954_v46  ;;  %v2551_v16 = vpop.permute.xlu1 %2550  ;;  %v5977_v39 = vld [vmem:[#allocation3 + $0x30] sm:$0xff] }
 0x3de   : > { %2595 = vst.msk [vmem:[#allocation3 + $0x40] sm:$0xff] %vm1058_vm5, %v2551_v16  ;;  %v4658_v16 = vld [vmem:[%s6450_s2 + $0x118] sm:$0xff]  }
 0x3df   : > { %2921 = vmatmul.mubr.bf16.gmra.mrb[32].mxu0 %v5977_v39 }
 0x3e0   : > { %4104 = vmatprep.mubr.msk.bf16.mxu0 %vm255_vm2, %v5981_v24  ;;  %3162 = vmatpush1.bf16.msra.mxu0 %v4639_v37  ;;  %v4657_v37 = vld [vmem:[%s6450_s2 + $0x110] sm:$0xff]  }
 0x3e1   : > { %3163 = vmatprep.subr.bf16.mxu0 %v5954_v46 }
 0x3e4   : > { %3164 = vmatpush1.bf16.msra.mxu0 %v4640_v33 }
 0x3e5   : > { %3165 = vmatprep.subr.bf16.mxu0 %v5954_v46  ;;  %v2553_v60 = vpop.permute.xlu0 %2552  ;;  %v5993_v25 = vld [vmem:[#allocation3 + $0x40] sm:$0xff] }
 0x3e6   : > { %2596 = vst.msk [vmem:[#allocation3 + $0x50] sm:$0xff] %vm1058_vm5, %v2553_v60 }
 0x3e7   : > { %2929 = vmatmul.mubr.bf16.gmra.mrb[36].mxu0 %v5993_v25 }
 0x3e8   : > { %4105 = vmatprep.mubr.msk.bf16.mxu0 %vm255_vm2, %v5997_v27  ;;  %3166 = vmatpush1.bf16.msra.mxu0 %v4641_v31  ;;  %v6265_v31 = vld [vmem:[%s6453_s5] ss:$0 sm:$0xff] }
 0x3e9   : > { %3167 = vmatprep.subr.bf16.mxu0 %v5954_v46 }
 0x3ec   : > { %3168 = vmatpush1.bf16.msra.mxu0 %v4642_v53 }
 0x3ed   : > { %3169 = vmatprep.subr.bf16.mxu0 %v5954_v46  ;;  %v2555_v28 = vpop.permute.xlu1 %2554  ;;  %v6009_v51 = vld [vmem:[#allocation3 + $0x50] sm:$0xff] }
 0x3ee   : > { %2597 = vst.msk [vmem:[#allocation3 + $0x60] sm:$0xff] %vm1058_vm5, %v2555_v28 }
 0x3ef   : > { %2937 = vmatmul.mubr.bf16.gmra.mrb[40].mxu0 %v6009_v51 }
 0x3f0   : > { %4106 = vmatprep.mubr.msk.bf16.mxu0 %vm255_vm2, %v6013_v8  ;;  %3170 = vmatpush1.bf16.msra.mxu0 %v4643_v14 }
 0x3f1   : > { %3171 = vmatprep.subr.bf16.mxu0 %v5954_v46 }
 0x3f4   : > { %3172 = vmatpush1.bf16.msra.mxu0 %v4644_v17 }
 0x3f5   : > { %3173 = vmatprep.subr.bf16.mxu0 %v5954_v46  ;;  %v2557_v9 = vpop.permute.xlu0 %2556  ;;  %v6025_v20 = vld [vmem:[#allocation3 + $0x60] sm:$0xff] }
 0x3f6   : > { %2598 = vst.msk [vmem:[#allocation3 + $0x70] sm:$0xff] %vm1058_vm5, %v2557_v9 }
 0x3f7   : > { %2945 = vmatmul.mubr.bf16.gmra.mrb[44].mxu0 %v6025_v20 }
 0x3f8   : > { %4107 = vmatprep.mubr.msk.bf16.mxu0 %vm255_vm2, %v6029_v18  ;;  %3174 = vmatpush1.bf16.msra.mxu0 %v4645_v29 }
 0x3f9   : > { %3175 = vmatprep.subr.bf16.mxu0 %v5954_v46 }
 0x3fc   : > { %3176 = vmatpush1.bf16.msra.mxu0 %v4646_v32 }
 0x3fd   : > { %3491 = vmatprep.subr.bf16.mxu0 %v5954_v46  ;;  %v2559_v55 = vpop.permute.xlu1 %2558  ;;  %v6038_v11 = vld [vmem:[#allocation3 + $0x70] sm:$0xff] }
 0x3fe   : > { %2599 = vst.msk [vmem:[#allocation3 + $0x80] sm:$0xff] %vm1058_vm5, %v2559_v55 }
 0x3ff   : > { %2953 = vmatmul.mubr.bf16.gmra.mrb[48].mxu0 %v6038_v11 }
 0x400   : > { %4108 = vmatprep.mubr.msk.bf16.mxu0 %vm255_vm2, %v6042_v62 }
 0x405   : > { %v2561_v1 = vpop.permute.xlu0 %2560  ;;  %v6046_v34 = vld [vmem:[#allocation3 + $0x80] sm:$0xff] }
 0x406   : > { %2600 = vst.msk [vmem:[#allocation3 + $0x90] sm:$0xff] %vm1058_vm5, %v2561_v1 }
 0x407   : > { %2961 = vmatmul.mubr.bf16.gmra.mrb[52].mxu0 %v6046_v34 }
 0x408   : > { %4109 = vmatprep.mubr.msk.bf16.mxu0 %vm255_vm2, %v6050_v47 }
 0x40d   : > { %v2563_v0 = vpop.permute.xlu1 %2562  ;;  %v6054_v6 = vld [vmem:[#allocation3 + $0x90] sm:$0xff] }
 0x40e   : > { %2601 = vst.msk [vmem:[#allocation3 + $0xa0] sm:$0xff] %vm1058_vm5, %v2563_v0 }
 0x40f   : > { %2969 = vmatmul.mubr.bf16.gmra.mrb[56].mxu0 %v6054_v6 }
 0x410   : > { %4110 = vmatprep.mubr.msk.bf16.mxu0 %vm255_vm2, %v6058_v54 }
 0x415   : > { %v2565_v52 = vpop.permute.xlu0 %2564  ;;  %v6062_v50 = vld [vmem:[#allocation3 + $0xa0] sm:$0xff] }
 0x416   : > { %2602 = vst.msk [vmem:[#allocation3 + $0xb0] sm:$0xff] %vm1058_vm5, %v2565_v52 }
 0x417   : > { %2977 = vmatmul.mubr.bf16.gmra.mrb[60].mxu0 %v6062_v50 }
 0x418   : > { %4111 = vmatprep.mubr.msk.bf16.mxu0 %vm255_vm2, %v6066_v63 }
 0x41d   : > { %v2567_v45 = vpop.permute.xlu1 %2566  ;;  %v6070_v61 = vld [vmem:[#allocation3 + $0xb0] sm:$0xff] }
 0x41e   : > { %2603 = vst.msk [vmem:[#allocation3 + $0xc0] sm:$0xff] %vm1058_vm5, %v2567_v45 }
 0x41f   : > { %2985 = vmatmul.mubr.bf16.gmra.mrb[64].mxu0 %v6070_v61 }
 0x420   : > { %4112 = vmatprep.mubr.msk.bf16.mxu0 %vm255_vm2, %v6074_v23 }
 0x425   : > { %v2569_v49 = vpop.permute.xlu0 %2568  ;;  %v6078_v30 = vld [vmem:[#allocation3 + $0xc0] sm:$0xff] }
 0x426   : > { %2604 = vst.msk [vmem:[#allocation3 + $0xd0] sm:$0xff] %vm1058_vm5, %v2569_v49 }
 0x427   : > { %2993 = vmatmul.mubr.bf16.gmra.mrb[68].mxu0 %v6078_v30 }
 0x428   : > { %4113 = vmatprep.mubr.msk.bf16.mxu0 %vm255_vm2, %v6082_v3 }
 0x42d   : > { %v2571_v22 = vpop.permute.xlu1 %2570  ;;  %v6086_v38 = vld [vmem:[#allocation3 + $0xd0] sm:$0xff] }
 0x42e   : > { %2605 = vst.msk [vmem:[#allocation3 + $0xe0] sm:$0xff] %vm1058_vm5, %v2571_v22 }
 0x42f   : > { %3001 = vmatmul.mubr.bf16.gmra.mrb[72].mxu0 %v6086_v38 }
 0x430   : > { %4114 = vmatprep.mubr.msk.bf16.mxu0 %vm255_vm2, %v6090_v19 }
 0x435   : > { %v2573_v56 = vpop.permute.xlu0 %2572  ;;  %v6094_v35 = vld [vmem:[#allocation3 + $0xe0] sm:$0xff] }
 0x436   : > { %2606 = vst.msk [vmem:[#allocation3 + $0xf0] sm:$0xff] %vm1058_vm5, %v2573_v56 }
 0x437   : > { %3009 = vmatmul.mubr.bf16.gmra.mrb[76].mxu0 %v6094_v35 }
 0x438   : > { %4115 = vmatprep.mubr.msk.bf16.mxu0 %vm255_vm2, %v6098_v5 }
 0x43d   : > { %v2575_v21 = vpop.permute.xlu1 %2574  ;;  %v6102_v43 = vld [vmem:[#allocation3 + $0xf0] sm:$0xff] }
 0x43e   : > { %2607 = vst.msk [vmem:[#allocation3 + $0x100] sm:$0xff] %vm1058_vm5, %v2575_v21 }
 0x43f   : > { %3017 = vmatmul.mubr.bf16.gmra.mrb[80].mxu0 %v6102_v43 }
 0x440   : > { %4116 = vmatprep.mubr.msk.bf16.mxu0 %vm255_vm2, %v6106_v58 }
 0x445   : > { %v6110_v42 = vld [vmem:[#allocation3 + $0x100] sm:$0xff] }
 0x447   : > { %3025 = vmatmul.mubr.bf16.gmra.mrb[84].mxu0 %v6110_v42 }
 0x448   : > { %4129 = vmatprep.mubr.msk.bf16.mxu0 %vm255_vm2, %v2641_v12 }
 0x44f   : > { %3186 = vmatmul.mubr.bf16.vlgmr.msra.gmra.mrb[24].mxu0 %v5954_v46 }
 0x450   : > { %3492 = vmatpush1.bf16.msra.mxu0 %v4647_v4  ;;  %4130 = vmatprep.mubr.msk.bf16.mxu0 %vm255_vm2, %v2643_v2 }
 0x451   : > { %3493 = vmatprep.subr.bf16.mxu0 %v5954_v46 }
 0x454   : > { %3494 = vmatpush1.bf16.msra.mxu0 %v4648_v59 }
 0x455   : > { %3495 = vmatprep.subr.bf16.mxu0 %v5954_v46 }
 0x457   : > { %3194 = vmatmul.mubr.bf16.gmra.mrb[28].mxu0 %v5941_v15  ;;  %v4652_v15 = vld [vmem:[%s6450_s2 + $0xe8] sm:$0xff]  }
 0x458   : > { %4131 = vmatprep.mubr.msk.bf16.mxu0 %vm255_vm2, %v5946_v7  ;;  %3496 = vmatpush1.bf16.msra.mxu0 %v4649_v44 }
 0x459   : > { %3497 = vmatprep.subr.bf16.mxu0 %v5954_v46 }
 0x45c   : > { %3498 = vmatpush1.bf16.msra.mxu0 %v4650_v13 }
 0x45d   : > { %3499 = vmatprep.subr.bf16.mxu0 %v5954_v46 }
 0x45f   : > { %3202 = vmatmul.mubr.bf16.gmra.mrb[32].mxu0 %v5961_v36 }
 0x460   : > { %4132 = vmatprep.mubr.msk.bf16.mxu0 %vm255_vm2, %v5965_v48  ;;  %3500 = vmatpush1.bf16.msra.mxu0 %v4651_v41 }
 0x461   : > { %3501 = vmatprep.subr.bf16.mxu0 %v5954_v46 }
 0x464   : > { %3502 = vmatpush1.bf16.msra.mxu0 %v4652_v15 }
 0x465   : > { %3503 = vmatprep.subr.bf16.mxu0 %v5954_v46 }
 0x467   : > { %3210 = vmatmul.mubr.bf16.gmra.mrb[36].mxu0 %v5977_v39 }
 0x468   : > { %4133 = vmatprep.mubr.msk.bf16.mxu0 %vm255_vm2, %v5981_v24  ;;  %3504 = vmatpush1.bf16.msra.mxu0 %v4653_v26 }
 0x469   : > { %3505 = vmatprep.subr.bf16.mxu0 %v5954_v46 }
 0x46c   : > { %3506 = vmatpush1.bf16.msra.mxu0 %v4654_v40 }
 0x46d   : > { %3507 = vmatprep.subr.bf16.mxu0 %v5954_v46 }
 0x46f   : > { %3218 = vmatmul.mubr.bf16.gmra.mrb[40].mxu0 %v5993_v25 }
 0x470   : > { %4134 = vmatprep.mubr.msk.bf16.mxu0 %vm255_vm2, %v5997_v27  ;;  %3508 = vmatpush1.bf16.msra.mxu0 %v4655_v10 }
 0x471   : > { %3509 = vmatprep.subr.bf16.mxu0 %v5954_v46 }
 0x474   : > { %3510 = vmatpush1.bf16.msra.mxu0 %v4656_v57 }
 0x475   : > { %3511 = vmatprep.subr.bf16.mxu0 %v5954_v46 }
 0x477   : > { %3226 = vmatmul.mubr.bf16.gmra.mrb[44].mxu0 %v6009_v51 }
 0x478   : > { %4135 = vmatprep.mubr.msk.bf16.mxu0 %vm255_vm2, %v6013_v8  ;;  %3512 = vmatpush1.bf16.msra.mxu0 %v4657_v37 }
 0x479   : > { %3513 = vmatprep.subr.bf16.mxu0 %v5954_v46 }
 0x47c   : > { %3514 = vmatpush1.bf16.msra.mxu0 %v4658_v16 }
 0x47f   : > { %3234 = vmatmul.mubr.bf16.gmra.mrb[48].mxu0 %v6025_v20 }
 0x480   : > { %4136 = vmatprep.mubr.msk.bf16.mxu0 %vm255_vm2, %v6029_v18 }
 0x487   : > { %3242 = vmatmul.mubr.bf16.gmra.mrb[52].mxu0 %v6038_v11 }
 0x488   : > { %4137 = vmatprep.mubr.msk.bf16.mxu0 %vm255_vm2, %v6042_v62 }
 0x48f   : > { %3250 = vmatmul.mubr.bf16.gmra.mrb[56].mxu0 %v6046_v34 }
 0x490   : > { %4138 = vmatprep.mubr.msk.bf16.mxu0 %vm255_vm2, %v6050_v47 }
 0x497   : > { %3258 = vmatmul.mubr.bf16.gmra.mrb[60].mxu0 %v6054_v6 }
 0x498   : > { %4139 = vmatprep.mubr.msk.bf16.mxu0 %vm255_vm2, %v6058_v54 }
 0x49f   : > { %3266 = vmatmul.mubr.bf16.gmra.mrb[64].mxu0 %v6062_v50 }
 0x4a0   : > { %4140 = vmatprep.mubr.msk.bf16.mxu0 %vm255_vm2, %v6066_v63 }
 0x4a7   : > { %3274 = vmatmul.mubr.bf16.gmra.mrb[68].mxu0 %v6070_v61 }
 0x4a8   : > { %4141 = vmatprep.mubr.msk.bf16.mxu0 %vm255_vm2, %v6074_v23 }
 0x4af   : > { %3282 = vmatmul.mubr.bf16.gmra.mrb[72].mxu0 %v6078_v30 }
 0x4b0   : > { %4142 = vmatprep.mubr.msk.bf16.mxu0 %vm255_vm2, %v6082_v3 }
 0x4b7   : > { %3290 = vmatmul.mubr.bf16.gmra.mrb[76].mxu0 %v6086_v38 }
 0x4b8   : > { %4143 = vmatprep.mubr.msk.bf16.mxu0 %vm255_vm2, %v6090_v19 }
 0x4bf   : > { %3298 = vmatmul.mubr.bf16.gmra.mrb[80].mxu0 %v6094_v35 }
 0x4c0   : > { %4144 = vmatprep.mubr.msk.bf16.mxu0 %vm255_vm2, %v6098_v5 }
 0x4c7   : > { %3306 = vmatmul.mubr.bf16.gmra.mrb[84].mxu0 %v6102_v43 }
 0x4c8   : > { %4181 = vmatprep.mubr.msk.bf16.mxu0 %vm255_vm2, %v5946_v7  ;;  %v3346_v7 = vld [vmem:[#allocation3 + $0x118] sm:$0xff] }
 0x4cf   : > { %3524 = vmatmul.mubr.bf16.vlgmr.msra.gmra.mrb[24].mxu0 %v5961_v36 }
 0x4d0   : > { %4182 = vmatprep.mubr.msk.bf16.mxu0 %vm255_vm2, %v5965_v48  ;;  %v6259_v48 = vld [vmem:[%s6451_s3] ss:$0 sm:$0xff] }
 0x4d7   : > { %3532 = vmatmul.mubr.bf16.gmra.mrb[28].mxu0 %v5977_v39 }
 0x4d8   : > { %4183 = vmatprep.mubr.msk.bf16.mxu0 %vm255_vm2, %v5981_v24 }
 0x4df   : > { %3540 = vmatmul.mubr.bf16.gmra.mrb[32].mxu0 %v5993_v25 }
 0x4e0   : > { %4184 = vmatprep.mubr.msk.bf16.mxu0 %vm255_vm2, %v5997_v27 }
 0x4e7   : > { %3548 = vmatmul.mubr.bf16.gmra.mrb[36].mxu0 %v6009_v51 }
 0x4e8   : > { %4185 = vmatprep.mubr.msk.bf16.mxu0 %vm255_vm2, %v6013_v8 }
 0x4ef   : > { %3556 = vmatmul.mubr.bf16.gmra.mrb[40].mxu0 %v6025_v20 }
 0x4f0   : > { %4186 = vmatprep.mubr.msk.bf16.mxu0 %vm255_vm2, %v6029_v18 }
 0x4f7   : > { %3564 = vmatmul.mubr.bf16.gmra.mrb[44].mxu0 %v6038_v11 }
 0x4f8   : > { %4187 = vmatprep.mubr.msk.bf16.mxu0 %vm255_vm2, %v6042_v62 }
 0x4ff   : > { %3572 = vmatmul.mubr.bf16.gmra.mrb[48].mxu0 %v6046_v34 }
 0x500   : > { %4188 = vmatprep.mubr.msk.bf16.mxu0 %vm255_vm2, %v6050_v47 }
 0x507   : > { %3580 = vmatmul.mubr.bf16.gmra.mrb[52].mxu0 %v6054_v6 }
 0x508   : > { %4189 = vmatprep.mubr.msk.bf16.mxu0 %vm255_vm2, %v6058_v54 }
 0x50f   : > { %3588 = vmatmul.mubr.bf16.gmra.mrb[56].mxu0 %v6062_v50 }
 0x510   : > { %4190 = vmatprep.mubr.msk.bf16.mxu0 %vm255_vm2, %v6066_v63 }
 0x517   : > { %3596 = vmatmul.mubr.bf16.gmra.mrb[60].mxu0 %v6070_v61 }
 0x518   : > { %4191 = vmatprep.mubr.msk.bf16.mxu0 %vm255_vm2, %v6074_v23 }
 0x51f   : > { %3604 = vmatmul.mubr.bf16.gmra.mrb[64].mxu0 %v6078_v30 }
 0x520   : > { %4192 = vmatprep.mubr.msk.bf16.mxu0 %vm255_vm2, %v6082_v3 }
 0x527   : > { %3612 = vmatmul.mubr.bf16.gmra.mrb[68].mxu0 %v6086_v38 }
 0x528   : > { %4193 = vmatprep.mubr.msk.bf16.mxu0 %vm255_vm2, %v6090_v19 }
 0x52f   : > { %3620 = vmatmul.mubr.bf16.gmra.mrb[72].mxu0 %v6094_v35 }
 0x530   : > { %4194 = vmatprep.mubr.msk.bf16.mxu0 %vm255_vm2, %v6098_v5 }
 0x537   : > { %3628 = vmatmul.mubr.bf16.gmra.mrb[76].mxu0 %v6102_v43 }
 0x538   : > { %4195 = vmatprep.mubr.msk.bf16.mxu0 %vm255_vm2, %v6106_v58 }
 0x53f   : > { %3636 = vmatmul.mubr.bf16.gmra.mrb[80].mxu0 %v6110_v42 }
 0x540   : > { %4196 = vmatprep.mubr.msk.bf16.mxu0 %vm255_vm2, %v3346_v7 }
 0x547   : > { %3644 = vmatmul.mubr.bf16.gmra.mrb[84].mxu0 %v5954_v46 }
 0x5a2   : > { %v3525_v36 = vpop.f32.mrb[24].mxu0 }
 0x5a3   : > { %v3684_v39 = vmul.f32 %v6259_v48, %v3525_v36  ;;  %v3527_v24 = vpop.f32.mrb[25].mxu0 }
 0x5a4   : > { %v3528_v33 = vpop.f32.mrb[26].mxu0 }
 0x5a5   : > { %v3716_v46 = vadd.f32 %v6265_v31, %v3684_v39  ;;  %v3685_v60 = vmul.f32 %v6259_v48, %v3528_v33  ;;  %v3530_v25 = vpop.f32.mrb[27].mxu0 }
 0x5a7   : > { %v3748_v27 = vmax.f32 %v3716_v46, 0.0  ;;  %v3717_v53 = vadd.f32 %v6265_v31, %v3685_v60 }
 0x5a9   : > { %3780 = vst.msk [vmem:[%s6270_s19] sm:$0xff] %vm255_vm2, %v3748_v27  ;;  %v3749_v14 = vmax.f32 %v3717_v53, 0.0 }
 0x5aa   : > { %v3533_v28 = vpop.f32.mrb[28].mxu0 }
 0x5ab   : > { %3781 = vst.msk [vmem:[%s6270_s19 + $0x8] sm:$0xff] %vm255_vm2, %v3749_v14  ;;  %v3686_v51 = vmul.f32 %v6259_v48, %v3533_v28  ;;  %v3535_v8 = vpop.f32.mrb[29].mxu0 }
 0x5ac   : > { %v3536_v17 = vpop.f32.mrb[30].mxu0 }
 0x5ad   : > { %v3718_v29 = vadd.f32 %v6265_v31, %v3686_v51  ;;  %v3687_v9 = vmul.f32 %v6259_v48, %v3536_v17  ;;  %v3538_v20 = vpop.f32.mrb[31].mxu0 }
 0x5af   : > { %v3750_v18 = vmax.f32 %v3718_v29, 0.0  ;;  %v3719_v32 = vadd.f32 %v6265_v31, %v3687_v9 }
 0x5b1   : > { %3782 = vst.msk [vmem:[%s6270_s19 + $0x10] sm:$0xff] %vm255_vm2, %v3750_v18  ;;  %v3751_v55 = vmax.f32 %v3719_v32, 0.0 }
 0x5b2   : > { %v3541_v11 = vpop.f32.mrb[32].mxu0 }
 0x5b3   : > { %3783 = vst.msk [vmem:[%s6270_s19 + $0x18] sm:$0xff] %vm255_vm2, %v3751_v55  ;;  %v3688_v62 = vmul.f32 %v6259_v48, %v3541_v11  ;;  %v3543_v1 = vpop.f32.mrb[33].mxu0 }
 0x5b4   : > { %v3544_v34 = vpop.f32.mrb[34].mxu0 }
 0x5b5   : > { %v3720_v47 = vadd.f32 %v6265_v31, %v3688_v62  ;;  %v3689_v0 = vmul.f32 %v6259_v48, %v3544_v34  ;;  %v3546_v6 = vpop.f32.mrb[35].mxu0 }
 0x5b7   : > { %v3752_v54 = vmax.f32 %v3720_v47, 0.0  ;;  %v3721_v52 = vadd.f32 %v6265_v31, %v3689_v0 }
 0x5b9   : > { %3784 = vst.msk [vmem:[%s6270_s19 + $0x20] sm:$0xff] %vm255_vm2, %v3752_v54  ;;  %v3753_v50 = vmax.f32 %v3721_v52, 0.0 }
 0x5ba   : > { %v3549_v63 = vpop.f32.mrb[36].mxu0 }
 0x5bb   : > { %3785 = vst.msk [vmem:[%s6270_s19 + $0x28] sm:$0xff] %vm255_vm2, %v3753_v50  ;;  %v3690_v45 = vmul.f32 %v6259_v48, %v3549_v63  ;;  %v3551_v61 = vpop.f32.mrb[37].mxu0 }
 0x5bc   : > { %v3552_v23 = vpop.f32.mrb[38].mxu0 }
 0x5bd   : > { %v3722_v49 = vadd.f32 %v6265_v31, %v3690_v45  ;;  %v3691_v30 = vmul.f32 %v6259_v48, %v3552_v23  ;;  %v3554_v3 = vpop.f32.mrb[39].mxu0 }
 0x5bf   : > { %v3754_v22 = vmax.f32 %v3722_v49, 0.0  ;;  %v3723_v38 = vadd.f32 %v6265_v31, %v3691_v30 }
 0x5c1   : > { %3786 = vst.msk [vmem:[%s6270_s19 + $0x30] sm:$0xff] %vm255_vm2, %v3754_v22  ;;  %v3755_v19 = vmax.f32 %v3723_v38, 0.0 }
 0x5c2   : > { %v3557_v56 = vpop.f32.mrb[40].mxu0 }
 0x5c3   : > { %3787 = vst.msk [vmem:[%s6270_s19 + $0x38] sm:$0xff] %vm255_vm2, %v3755_v19  ;;  %v3692_v35 = vmul.f32 %v6259_v48, %v3557_v56  ;;  %v3559_v5 = vpop.f32.mrb[41].mxu0 }
 0x5c4   : > { %v3560_v21 = vpop.f32.mrb[42].mxu0 }
 0x5c5   : > { %v3724_v43 = vadd.f32 %v6265_v31, %v3692_v35  ;;  %v3693_v58 = vmul.f32 %v6259_v48, %v3560_v21  ;;  %v3562_v12 = vpop.f32.mrb[43].mxu0 }
 0x5c7   : > { %v3756_v42 = vmax.f32 %v3724_v43, 0.0  ;;  %v3725_v4 = vadd.f32 %v6265_v31, %v3693_v58 }
 0x5c9   : > { %3788 = vst.msk [vmem:[%s6270_s19 + $0x40] sm:$0xff] %vm255_vm2, %v3756_v42  ;;  %v3757_v2 = vmax.f32 %v3725_v4, 0.0 }
 0x5ca   : > { %v3565_v59 = vpop.f32.mrb[44].mxu0 }
 0x5cb   : > { %3789 = vst.msk [vmem:[%s6270_s19 + $0x48] sm:$0xff] %vm255_vm2, %v3757_v2  ;;  %v3694_v44 = vmul.f32 %v6259_v48, %v3565_v59  ;;  %v3567_v13 = vpop.f32.mrb[45].mxu0 }
 0x5cc   : > { %v3568_v41 = vpop.f32.mrb[46].mxu0 }
 0x5cd   : > { %v3726_v15 = vadd.f32 %v6265_v31, %v3694_v44  ;;  %v3695_v26 = vmul.f32 %v6259_v48, %v3568_v41  ;;  %v3570_v40 = vpop.f32.mrb[47].mxu0 }
 0x5cf   : > { %v3758_v10 = vmax.f32 %v3726_v15, 0.0  ;;  %v3727_v57 = vadd.f32 %v6265_v31, %v3695_v26 }
 0x5d1   : > { %3790 = vst.msk [vmem:[%s6270_s19 + $0x50] sm:$0xff] %vm255_vm2, %v3758_v10  ;;  %v3759_v37 = vmax.f32 %v3727_v57, 0.0 }
 0x5d2   : > { %v3573_v16 = vpop.f32.mrb[48].mxu0 }
 0x5d3   : > { %3791 = vst.msk [vmem:[%s6270_s19 + $0x58] sm:$0xff] %vm255_vm2, %v3759_v37  ;;  %v3696_v7 = vmul.f32 %v6259_v48, %v3573_v16  ;;  %v3575_v36 = vpop.f32.mrb[49].mxu0 }
 0x5d4   : > { %v3576_v39 = vpop.f32.mrb[50].mxu0 }
 0x5d5   : > { %v3728_v24 = vadd.f32 %v6265_v31, %v3696_v7  ;;  %v3697_v33 = vmul.f32 %v6259_v48, %v3576_v39  ;;  %v3578_v46 = vpop.f32.mrb[51].mxu0 }
 0x5d7   : > { %v3760_v60 = vmax.f32 %v3728_v24, 0.0  ;;  %v3729_v25 = vadd.f32 %v6265_v31, %v3697_v33 }
 0x5d9   : > { %3792 = vst.msk [vmem:[%s6270_s19 + $0x60] sm:$0xff] %vm255_vm2, %v3760_v60  ;;  %v3761_v27 = vmax.f32 %v3729_v25, 0.0 }
 0x5da   : > { %v3581_v53 = vpop.f32.mrb[52].mxu0 }
 0x5db   : > { %3793 = vst.msk [vmem:[%s6270_s19 + $0x68] sm:$0xff] %vm255_vm2, %v3761_v27  ;;  %v3698_v14 = vmul.f32 %v6259_v48, %v3581_v53  ;;  %v3583_v28 = vpop.f32.mrb[53].mxu0 }
 0x5dc   : > { %v3584_v51 = vpop.f32.mrb[54].mxu0 }
 0x5dd   : > { %v3730_v8 = vadd.f32 %v6265_v31, %v3698_v14  ;;  %v3699_v17 = vmul.f32 %v6259_v48, %v3584_v51  ;;  %v3586_v29 = vpop.f32.mrb[55].mxu0 }
 0x5df   : > { %v3762_v9 = vmax.f32 %v3730_v8, 0.0  ;;  %v3731_v20 = vadd.f32 %v6265_v31, %v3699_v17 }
 0x5e1   : > { %3794 = vst.msk [vmem:[%s6270_s19 + $0x70] sm:$0xff] %vm255_vm2, %v3762_v9  ;;  %v3763_v18 = vmax.f32 %v3731_v20, 0.0 }
 0x5e2   : > { %v3589_v32 = vpop.f32.mrb[56].mxu0 }
 0x5e3   : > { %3795 = vst.msk [vmem:[%s6270_s19 + $0x78] sm:$0xff] %vm255_vm2, %v3763_v18  ;;  %v3700_v55 = vmul.f32 %v6259_v48, %v3589_v32  ;;  %v3591_v11 = vpop.f32.mrb[57].mxu0 }
 0x5e4   : > { %v3592_v62 = vpop.f32.mrb[58].mxu0 }
 0x5e5   : > { %v3732_v1 = vadd.f32 %v6265_v31, %v3700_v55  ;;  %v3701_v34 = vmul.f32 %v6259_v48, %v3592_v62  ;;  %v3594_v47 = vpop.f32.mrb[59].mxu0 }
 0x5e7   : > { %v3764_v0 = vmax.f32 %v3732_v1, 0.0  ;;  %v3733_v6 = vadd.f32 %v6265_v31, %v3701_v34 }
 0x5e9   : > { %3796 = vst.msk [vmem:[%s6270_s19 + $0x80] sm:$0xff] %vm255_vm2, %v3764_v0  ;;  %v3765_v54 = vmax.f32 %v3733_v6, 0.0 }
 0x5ea   : > { %v3597_v52 = vpop.f32.mrb[60].mxu0 }
 0x5eb   : > { %3797 = vst.msk [vmem:[%s6270_s19 + $0x88] sm:$0xff] %vm255_vm2, %v3765_v54  ;;  %v3702_v50 = vmul.f32 %v6259_v48, %v3597_v52  ;;  %v3599_v63 = vpop.f32.mrb[61].mxu0 }
 0x5ec   : > { %v3600_v45 = vpop.f32.mrb[62].mxu0 }
 0x5ed   : > { %v3734_v61 = vadd.f32 %v6265_v31, %v3702_v50  ;;  %v3703_v23 = vmul.f32 %v6259_v48, %v3600_v45  ;;  %v3602_v49 = vpop.f32.mrb[63].mxu0 }
 0x5ef   : > { %v3766_v30 = vmax.f32 %v3734_v61, 0.0  ;;  %v3735_v3 = vadd.f32 %v6265_v31, %v3703_v23 }
 0x5f1   : > { %3798 = vst.msk [vmem:[%s6270_s19 + $0x90] sm:$0xff] %vm255_vm2, %v3766_v30  ;;  %v3767_v22 = vmax.f32 %v3735_v3, 0.0 }
 0x5f2   : > { %v3605_v38 = vpop.f32.mrb[64].mxu0 }
 0x5f3   : > { %3799 = vst.msk [vmem:[%s6270_s19 + $0x98] sm:$0xff] %vm255_vm2, %v3767_v22  ;;  %v3704_v19 = vmul.f32 %v6259_v48, %v3605_v38  ;;  %v3607_v56 = vpop.f32.mrb[65].mxu0 }
 0x5f4   : > { %v3608_v35 = vpop.f32.mrb[66].mxu0 }
 0x5f5   : > { %v3736_v5 = vadd.f32 %v6265_v31, %v3704_v19  ;;  %v3705_v21 = vmul.f32 %v6259_v48, %v3608_v35  ;;  %v3610_v43 = vpop.f32.mrb[67].mxu0 }
 0x5f7   : > { %v3768_v58 = vmax.f32 %v3736_v5, 0.0  ;;  %v3737_v12 = vadd.f32 %v6265_v31, %v3705_v21 }
 0x5f9   : > { %3800 = vst.msk [vmem:[%s6270_s19 + $0xa0] sm:$0xff] %vm255_vm2, %v3768_v58  ;;  %v3769_v42 = vmax.f32 %v3737_v12, 0.0 }
 0x5fa   : > { %v3613_v4 = vpop.f32.mrb[68].mxu0 }
 0x5fb   : > { %3801 = vst.msk [vmem:[%s6270_s19 + $0xa8] sm:$0xff] %vm255_vm2, %v3769_v42  ;;  %v3706_v2 = vmul.f32 %v6259_v48, %v3613_v4  ;;  %v3615_v59 = vpop.f32.mrb[69].mxu0 }
 0x5fc   : > { %v3616_v44 = vpop.f32.mrb[70].mxu0 }
 0x5fd   : > { %v3738_v13 = vadd.f32 %v6265_v31, %v3706_v2  ;;  %v3707_v41 = vmul.f32 %v6259_v48, %v3616_v44  ;;  %v3618_v15 = vpop.f32.mrb[71].mxu0 }
 0x5ff   : > { %v3770_v26 = vmax.f32 %v3738_v13, 0.0  ;;  %v3739_v40 = vadd.f32 %v6265_v31, %v3707_v41 }
 0x601   : > { %3802 = vst.msk [vmem:[%s6270_s19 + $0xb0] sm:$0xff] %vm255_vm2, %v3770_v26  ;;  %v3771_v10 = vmax.f32 %v3739_v40, 0.0 }
 0x602   : > { %v3621_v57 = vpop.f32.mrb[72].mxu0 }
 0x603   : > { %3803 = vst.msk [vmem:[%s6270_s19 + $0xb8] sm:$0xff] %vm255_vm2, %v3771_v10  ;;  %v3708_v37 = vmul.f32 %v6259_v48, %v3621_v57  ;;  %v3623_v16 = vpop.f32.mrb[73].mxu0 }
 0x604   : > { %v3624_v7 = vpop.f32.mrb[74].mxu0 }
 0x605   : > { %v3740_v36 = vadd.f32 %v6265_v31, %v3708_v37  ;;  %v3709_v39 = vmul.f32 %v6259_v48, %v3624_v7  ;;  %v3626_v24 = vpop.f32.mrb[75].mxu0 }
 0x607   : > { %v3772_v33 = vmax.f32 %v3740_v36, 0.0  ;;  %v3741_v46 = vadd.f32 %v6265_v31, %v3709_v39 }
 0x609   : > { %3804 = vst.msk [vmem:[%s6270_s19 + $0xc0] sm:$0xff] %vm255_vm2, %v3772_v33  ;;  %v3773_v60 = vmax.f32 %v3741_v46, 0.0 }
 0x60a   : > { %v3629_v25 = vpop.f32.mrb[76].mxu0 }
 0x60b   : > { %3805 = vst.msk [vmem:[%s6270_s19 + $0xc8] sm:$0xff] %vm255_vm2, %v3773_v60  ;;  %v3710_v27 = vmul.f32 %v6259_v48, %v3629_v25  ;;  %v3631_v53 = vpop.f32.mrb[77].mxu0 }
 0x60c   : > { %v3632_v14 = vpop.f32.mrb[78].mxu0 }
 0x60d   : > { %v3742_v28 = vadd.f32 %v6265_v31, %v3710_v27  ;;  %v3711_v51 = vmul.f32 %v6259_v48, %v3632_v14  ;;  %v3634_v8 = vpop.f32.mrb[79].mxu0 }
 0x60f   : > { %v3774_v17 = vmax.f32 %v3742_v28, 0.0  ;;  %v3743_v29 = vadd.f32 %v6265_v31, %v3711_v51 }
 0x611   : > { %3806 = vst.msk [vmem:[%s6270_s19 + $0xd0] sm:$0xff] %vm255_vm2, %v3774_v17  ;;  %v3775_v9 = vmax.f32 %v3743_v29, 0.0 }
 0x612   : > { %v3637_v20 = vpop.f32.mrb[80].mxu0 }
 0x613   : > { %3807 = vst.msk [vmem:[%s6270_s19 + $0xd8] sm:$0xff] %vm255_vm2, %v3775_v9  ;;  %v3712_v18 = vmul.f32 %v6259_v48, %v3637_v20  ;;  %v3639_v32 = vpop.f32.mrb[81].mxu0 }
 0x614   : > { %v3640_v55 = vpop.f32.mrb[82].mxu0 }
 0x615   : > { %v3744_v11 = vadd.f32 %v6265_v31, %v3712_v18  ;;  %v3713_v62 = vmul.f32 %v6259_v48, %v3640_v55  ;;  %v3642_v1 = vpop.f32.mrb[83].mxu0 }
 0x617   : > { %v3776_v34 = vmax.f32 %v3744_v11, 0.0  ;;  %v3745_v47 = vadd.f32 %v6265_v31, %v3713_v62 }
 0x619   : > { %3808 = vst.msk [vmem:[%s6270_s19 + $0xe0] sm:$0xff] %vm255_vm2, %v3776_v34  ;;  %v3777_v0 = vmax.f32 %v3745_v47, 0.0 }
 0x61a   : > { %v3645_v6 = vpop.f32.mrb[84].mxu0 }
 0x61b   : > { %3809 = vst.msk [vmem:[%s6270_s19 + $0xe8] sm:$0xff] %vm255_vm2, %v3777_v0  ;;  %v3714_v54 = vmul.f32 %v6259_v48, %v3645_v6  ;;  %v3647_v52 = vpop.f32.mrb[85].mxu0 }
 0x61c   : > { %v3648_v50 = vpop.f32.mrb[86].mxu0 }
 0x61d   : > { %v3746_v63 = vadd.f32 %v6265_v31, %v3714_v54  ;;  %v3715_v45 = vmul.f32 %v6259_v48, %v3648_v50  ;;  %v3650_v61 = vpop.f32.mrb[87].mxu0 }
 0x61f   : > { %v3778_v23 = vmax.f32 %v3746_v63, 0.0  ;;  %v3747_v49 = vadd.f32 %v6265_v31, %v3715_v45 }
 0x621   : > { %3810 = vst.msk [vmem:[%s6270_s19 + $0xf0] sm:$0xff] %vm255_vm2, %v3778_v23  ;;  %v3779_v30 = vmax.f32 %v3747_v49, 0.0 }
 0x623   : > { %3811 = vst.msk [vmem:[%s6270_s19 + $0xf8] sm:$0xff] %vm255_vm2, %v3779_v30 }
 0x624   : > { %4677 = shalt.err (!%p4674_p3)
}
 0x625   : > { %s4678_s12 = scalar_lea.hbm %s6397_s9, 4096  ;;  %s4682_s16 = scalar_lea.hbm %s6454_s6, 8192 }
 0x626   : > { %p4679_p4 = scmp.ne.s32.totalorder %s6397_s9, %s4678_s12  ;;  %p4683_p9 = scmp.lt.u32.totalorder %s6397_s9, %s6454_s6 }
 0x627   : > { %p4684_p10 = scmp.lt.u32.totalorder %s4682_s16, %s4678_s12  ;;  %p4686_p12 = scmp.lt.u32.totalorder %s4678_s12, %s6397_s9 }
 0x628   : > { %p4680_p7 = pnand %p4679_p4, %p4806_p5 }
 0x629   : > { %p4685_p11 = por %p4684_p10, %p4683_p9 }
 0x62a   : > { %p4681_p8 = pneg %p4680_p7 }
 0x62b   : > { %p4687_p13 = por %p4686_p12, %p4685_p11 }
 0x62d   : > { %p4688_p0 = pnand %p4687_p13, %p4681_p8 }
 0x62f   : > { %4691 = shalt.err (!%p4688_p0)
}
 0x630   : > { %s4731_s20 = smov 128   ;;  %s4732_s28 = smov 8  }
 0x631   : > { %4525 = dma.vmem_to_hbm [thread:$0]  (%p4806_p5), %s6399_s26, 4096, %s6397_s9, %s6407_s25, %s4731_s20, %s4731_s20, %s4732_s28  }
 0x632 PF: > { %p4531_p1 = scmp.ge.s32.totalorder %s4726_s24, 2  ;;  %s3841_s29 = sand.u32 1, %s4714_s21  }
 0x633   : > { %s3842_s10 = scalar_lea.sflag [#allocation5], %s3841_s29 }
 0x634   : > { %p4528_p2 = pnand %p4531_p1, %p4810_p6 }
 0x636   : > { %4709 = dma.done.wait (!%p4528_p2), %s3842_s10, 4096  }
 0x637   : > { %4711 = vsyncadd (!%p4528_p2), %s3842_s10, 4294963200  ;;  %p16_p3 = scmp.ge.s32.totalorder %s4793_s27, 4   ;;  %s6485_s21 = smov %s4718_s22 }
 0x638   : > { %s6486_s22 = smov %s4722_s23  ;;  %s6487_s23 = smov %s4804_s30 }
 0x639   : > { %s6488_s24 = smov %s4793_s27  ;;  %18 = sbr.rel (!%p16_p3) target bundleno = 3 (0x3), region = 87 }
 0x640   :  { %3847 = vsyncpa [#allocation5], 1 }
 0x641   :  { %3849 = vsyncpa [#allocation5 + $0x1], 1 }

</bundles_post_ra>
